<compile_context>
chip_gen: v7x
topology: tpu7x:2x2x1
jax: 0.10.0
libtpu: 0.0.40
codegen_flags: <defaults>
</compile_context>

<pallas_src>
import functools

import jax
import jax.numpy as jnp
from jax import lax
from jax.experimental import pallas as pl
from jax.experimental.pallas import tpu as pltpu


def encoder_layer_kernel(src_q_ref, src_full_ref, bias_ref,
                         wq_ref, bq_ref, wk_ref, bk_ref, wv_ref, bv_ref,
                         wo_ref, bo_ref,
                         ln1_g_ref, ln1_b_ref,
                         w1_ref, b1_ref, w2_ref, b2_ref,
                         ln2_g_ref, ln2_b_ref,
                         out_ref,
                         k_scr, v_scr,
                         *, n_heads, head_dim, compute_dtype, approx_recip):
    f32 = jnp.float32
    cd = compute_dtype
    qi = pl.program_id(1)

    def mm(a, b):                                    # MXU matmul, f32 accumulation
        return jnp.dot(a, b, preferred_element_type=f32)

    # ---- K / V projections: computed once per batch element (query-tile 0), head-major
    #      straight from head-major weights (no lane slicing / relayout), cached in VMEM
    #      scratch and reused by every query tile of this batch element. ----
    @pl.when(qi == 0)
    def _():
        xf = src_full_ref[0].astype(cd)              # (S, H)
        for h in range(n_heads):
            k_scr[h] = (mm(xf, wk_ref[h]) + bk_ref[h]).astype(cd)   # (S, hd)
            v_scr[h] = (mm(xf, wv_ref[h]) + bv_ref[h]).astype(cd)   # (S, hd)

    xq = src_q_ref[0]                                # (Tq, H) f32
    xq_c = xq.astype(cd)
    bias = bias_ref[0]                               # (1, S) additive mask bias, f32

    # ---- Attention: per-head (statically unrolled) so only one (Tq, S) score tile is
    #      live at a time. 1/sqrt(head_dim) is already folded into wq/bq.  The output
    #      projection accumulates ctx_h @ wo_h across heads into one (Tq, H) f32 buffer
    #      (no (nH, S, H) intermediate, no concatenate).
    #      NOTE: mask is applied additively (score - 1e10) while the reference replaces the
    #      score with -1e10; identical after f32 softmax for any realistic score magnitude.
    attn = jnp.zeros_like(xq)                        # (Tq, H) f32 accumulator
    for h in range(n_heads):
        q_h = (mm(xq_c, wq_ref[h]) + bq_ref[h]).astype(cd)           # (Tq, hd)
        # scores: contract head_dim of q with head_dim of cached K (no transpose copy)
        e = lax.dot_general(q_h, k_scr[h],
                            (((1,), (1,)), ((), ())),
                            preferred_element_type=f32)              # (Tq, S)
        e = e + bias
        e = e - jnp.max(e, axis=-1, keepdims=True)
        p = jnp.exp(e)
        p = p * pl.reciprocal(jnp.sum(p, axis=-1, keepdims=True), approx=approx_recip)
        ctx = mm(p.astype(cd), v_scr[h])                              # (Tq, hd) f32
        attn = attn + mm(ctx.astype(cd), wo_ref[h])                   # (Tq, H)  f32
    attn = attn + bo_ref[0]

    # ---- Residual + LayerNorm 1 (dropout = identity in eval) ----
    s1 = xq + attn
    mu = jnp.mean(s1, axis=-1, keepdims=True)
    var = jnp.mean((s1 - mu) ** 2, axis=-1, keepdims=True)
    s1 = (s1 - mu) * lax.rsqrt(var + 1e-5) * ln1_g_ref[0] + ln1_b_ref[0]

    # ---- Position-wise feed-forward (ReLU) ----
    f = mm(s1.astype(cd), w1_ref[...]) + b1_ref[0]
    f = jnp.maximum(f, 0.0)
    f = mm(f.astype(cd), w2_ref[...]) + b2_ref[0]

    # ---- Residual + LayerNorm 2 ----
    s2 = s1 + f
    mu2 = jnp.mean(s2, axis=-1, keepdims=True)
    var2 = jnp.mean((s2 - mu2) ** 2, axis=-1, keepdims=True)
    out_ref[0] = ((s2 - mu2) * lax.rsqrt(var2 + 1e-5)
                  * ln2_g_ref[0] + ln2_b_ref[0]).astype(out_ref.dtype)


def _vmem_limit_bytes():
    # Size the scoped-VMEM budget from the chip (v7x: 64 MiB/TC, v5e/v6e: 128 MiB),
    # leaving headroom for compiler-internal scratch.
    try:
        cap = int(pltpu.get_tpu_info().vmem_capacity_bytes)
        return min(cap * 3 // 4, 100 * 1024 * 1024)
    except Exception:
        return 64 * 1024 * 1024


def encoder_layer(src, src_mask, params, n_heads, *,
                  compute_dtype=jnp.float32, approx_recip=False, q_tile=None):
    B, S, H = src.shape
    P = params["w1"].shape[1]
    assert H % n_heads == 0
    head_dim = H // n_heads
    f32 = jnp.float32
    cd = compute_dtype

    # Query-tile size: must divide S and be sublane-aligned (multiple of 8) unless it is S.
    if q_tile is None:
        if S <= 256:
            q_tile = S
        else:
            divs = [t for t in (256, 128, 64, 32, 16, 8) if S % t == 0]
            q_tile = divs[0] if divs else S
    q_tile = min(q_tile, S)
    assert S % q_tile == 0 and (q_tile == S or q_tile % 8 == 0)
    n_q = S // q_tile

    # One-time wrapper-side (XLA) weight prep:
    #   * head-major layouts so the kernel never lane-slices activations,
    #   * 1/sqrt(head_dim) folded into the q projection,
    #   * matmul weights in the compute dtype (halves weight DMA/VMEM in bf16 mode).
    scale = 1.0 / (head_dim ** 0.5)
    def heads_w(w):   # (H, H) -> (nH, H, hd)
        return w.reshape(H, n_heads, head_dim).transpose(1, 0, 2)
    def heads_b(b):   # (1, H) -> (nH, 1, hd)
        return b.reshape(1, n_heads, head_dim).transpose(1, 0, 2)

    wq = heads_w(params["wq"] * scale).astype(cd)
    bq = heads_b(params["bq"] * scale).astype(f32)
    wk = heads_w(params["wk"]).astype(cd)
    bk = heads_b(params["bk"]).astype(f32)
    wv = heads_w(params["wv"]).astype(cd)
    bv = heads_b(params["bv"]).astype(f32)
    wo = params["wo"].reshape(n_heads, head_dim, H).astype(cd)   # head-major out-proj
    w1 = params["w1"].astype(cd)
    w2 = params["w2"].astype(cd)

    # Additive mask bias precomputed once: 0 where attend, -1e10 where masked.
    bias = jnp.where(src_mask == 0, jnp.float32(-1e10), jnp.float32(0.0))    # (B, 1, S)

    # Grid-invariant specs: single-buffered (constant block index -> no prefetch needed),
    # halving their VMEM footprint vs. the default double buffering.
    def invariant(shape):
        n = len(shape)
        return pl.BlockSpec(shape, lambda b, q, n=n: (0,) * n,
                            pipeline_mode=pl.Buffered(1))

    kernel = functools.partial(
        encoder_layer_kernel, n_heads=n_heads, head_dim=head_dim,
        compute_dtype=cd, approx_recip=approx_recip)

    return pl.pallas_call(
        kernel,
        out_shape=jax.ShapeDtypeStruct((B, S, H), jnp.float32),
        grid=(B, n_q),
        in_specs=[
            pl.BlockSpec((1, q_tile, H), lambda b, q: (b, q, 0)),   # src (query tile)
            pl.BlockSpec((1, S, H), lambda b, q: (b, 0, 0)),        # src (full seq, for K/V)
            pl.BlockSpec((1, 1, S), lambda b, q: (b, 0, 0)),        # additive mask bias
            invariant((n_heads, H, head_dim)), invariant((n_heads, 1, head_dim)),  # wq, bq
            invariant((n_heads, H, head_dim)), invariant((n_heads, 1, head_dim)),  # wk, bk
            invariant((n_heads, H, head_dim)), invariant((n_heads, 1, head_dim)),  # wv, bv
            invariant((n_heads, head_dim, H)), invariant((1, H)),                  # wo, bo
            invariant((1, H)), invariant((1, H)),                                  # ln1 g/b
            invariant((H, P)), invariant((1, P)),                                  # w1, b1
            invariant((P, H)), invariant((1, H)),                                  # w2, b2
            invariant((1, H)), invariant((1, H)),                                  # ln2 g/b
        ],
        out_specs=pl.BlockSpec((1, q_tile, H), lambda b, q: (b, q, 0)),
        scratch_shapes=[
            pltpu.VMEM((n_heads, S, head_dim), cd),   # cached K (head-major), persists over q tiles
            pltpu.VMEM((n_heads, S, head_dim), cd),   # cached V (head-major)
        ],
        compiler_params=pltpu.CompilerParams(
            # batch axis feeds both v7x TensorCores; q-tile axis must stay "arbitrary"
            # because K/V scratch written at q==0 is reused by later q tiles.
            dimension_semantics=("parallel", "arbitrary"),
            vmem_limit_bytes=_vmem_limit_bytes()),
    )(src, src, bias,
      wq, bq, wk, bk, wv, bv, wo, params["bo"],
      params["ln1_g"], params["ln1_b"],
      w1, params["b1"], w2, params["b2"],
      params["ln2_g"], params["ln2_b"])


def reference(src, src_mask, params, n_heads):
    """Pure-JAX reference matching the PyTorch forward (dropout = identity)."""
    B, S, H = src.shape
    hd = H // n_heads
    q = src @ params["wq"] + params["bq"][0]
    k = src @ params["wk"] + params["bk"][0]
    v = src @ params["wv"] + params["bv"][0]
    q = q.reshape(B, S, n_heads, hd).transpose(0, 2, 1, 3)
    k = k.reshape(B, S, n_heads, hd).transpose(0, 2, 1, 3)
    v = v.reshape(B, S, n_heads, hd).transpose(0, 2, 1, 3)
    e = jnp.einsum("bhqd,bhkd->bhqk", q, k) / jnp.sqrt(jnp.float32(hd))
    e = jnp.where(src_mask[:, None, :, :] == 0, -1e10, e)
    a = jax.nn.softmax(e, axis=-1)
    x = jnp.einsum("bhqk,bhkd->bhqd", a, v).transpose(0, 2, 1, 3).reshape(B, S, H)
    x = x @ params["wo"] + params["bo"][0]

    def ln(y, g, b):
        mu = jnp.mean(y, axis=-1, keepdims=True)
        var = jnp.mean((y - mu) ** 2, axis=-1, keepdims=True)
        return (y - mu) / jnp.sqrt(var + 1e-5) * g[0] + b[0]

    s1 = ln(src + x, params["ln1_g"], params["ln1_b"])
    f = jnp.maximum(s1 @ params["w1"] + params["b1"][0], 0.0) @ params["w2"] + params["b2"][0]
    return ln(s1 + f, params["ln2_g"], params["ln2_b"])


if __name__ == "__main__":
    B, S, H, P, NH = 2, 8, 32, 64, 4

    key = jax.random.PRNGKey(0)
    keys = jax.random.split(key, 16)

    def u(k, shape, fan_in):
        bound = 1.0 / (fan_in ** 0.5)
        return jax.random.uniform(k, shape, jnp.float32, -bound, bound)

    params = {
        "wq": u(keys[0], (H, H), H), "bq": u(keys[1], (1, H), H),
        "wk": u(keys[2], (H, H), H), "bk": u(keys[3], (1, H), H),
        "wv": u(keys[4], (H, H), H), "bv": u(keys[5], (1, H), H),
        "wo": u(keys[6], (H, H), H), "bo": u(keys[7], (1, H), H),
        "ln1_g": jnp.ones((1, H), jnp.float32), "ln1_b": jnp.zeros((1, H), jnp.float32),
        "w1": u(keys[8], (H, P), H), "b1": u(keys[9], (1, P), H),
        "w2": u(keys[10], (P, H), P), "b2": u(keys[11], (1, H), P),
        "ln2_g": jnp.ones((1, H), jnp.float32), "ln2_b": jnp.zeros((1, H), jnp.float32),
    }

    src = jax.random.normal(keys[12], (B, S, H), jnp.float32)
    # mask: keep first 6 positions for batch 0, all 8 for batch 1
    src_mask = jnp.stack([
        jnp.concatenate([jnp.ones((6,)), jnp.zeros((2,))]).reshape(1, S),
        jnp.ones((1, S)),
    ]).astype(jnp.float32)                                   # (B, 1, S)

    ref = reference(src, src_mask, params, NH)

    # Strict-tolerance correctness gate: f32 compute, exact reciprocal, single q tile.
    out = encoder_layer(src, src_mask, params, NH)
    out = jax.block_until_ready(out)
    assert out.shape == (B, S, H)
    assert jnp.allclose(out, ref, atol=1e-4, rtol=1e-4), "f32 mismatch vs pure-JAX reference"

    # bf16 MXU path (f32 accumulation, softmax/LayerNorm in f32, EUP approx reciprocal).
    out_bf16 = encoder_layer(src, src_mask, params, NH,
                             compute_dtype=jnp.bfloat16, approx_recip=True)
    out_bf16 = jax.block_until_ready(out_bf16)
    assert jnp.allclose(out_bf16, ref, atol=1e-1, rtol=1e-1), "bf16 mismatch vs reference"

    # Exercise the query-tiled path (grid=(B, S//Tq)) with K/V cached in VMEM scratch
    # across query tiles.
    S2 = 16
    src2 = jax.random.normal(keys[13], (B, S2, H), jnp.float32)
    mask2 = jnp.stack([
        jnp.concatenate([jnp.ones((10,)), jnp.zeros((6,))]).reshape(1, S2),
        jnp.ones((1, S2)),
    ]).astype(jnp.float32)                                   # (B, 1, S2)
    ref2 = reference(src2, mask2, params, NH)
    out2 = encoder_layer(src2, mask2, params, NH, q_tile=8)
    out2 = jax.block_until_ready(out2)
    assert jnp.allclose(out2, ref2, atol=1e-4, rtol=1e-4), "q-tiled mismatch vs reference"

    print("KERNEL_OK")
</pallas_src>

<mosaic_0001>
module attributes {stable_mosaic.version = 11 : i64} {
  func.func @encoder_layer_kernel(%arg0: i32, %arg1: i32, %arg2: memref<1x8x32xf32, #tpu.memory_space<vmem>>, %arg3: memref<1x8x32xf32, #tpu.memory_space<vmem>>, %arg4: memref<1x1x8xf32, #tpu.memory_space<vmem>>, %arg5: memref<4x32x8xf32, #tpu.memory_space<vmem>>, %arg6: memref<4x1x8xf32, #tpu.memory_space<vmem>>, %arg7: memref<4x32x8xf32, #tpu.memory_space<vmem>>, %arg8: memref<4x1x8xf32, #tpu.memory_space<vmem>>, %arg9: memref<4x32x8xf32, #tpu.memory_space<vmem>>, %arg10: memref<4x1x8xf32, #tpu.memory_space<vmem>>, %arg11: memref<4x8x32xf32, #tpu.memory_space<vmem>>, %arg12: memref<1x32xf32, #tpu.memory_space<vmem>>, %arg13: memref<1x32xf32, #tpu.memory_space<vmem>>, %arg14: memref<1x32xf32, #tpu.memory_space<vmem>>, %arg15: memref<32x64xf32, #tpu.memory_space<vmem>>, %arg16: memref<1x64xf32, #tpu.memory_space<vmem>>, %arg17: memref<64x32xf32, #tpu.memory_space<vmem>>, %arg18: memref<1x32xf32, #tpu.memory_space<vmem>>, %arg19: memref<1x32xf32, #tpu.memory_space<vmem>>, %arg20: memref<1x32xf32, #tpu.memory_space<vmem>>, %arg21: memref<1x8x32xf32, #tpu.memory_space<vmem>>, %arg22: memref<4x8x8xf32, #tpu.memory_space<vmem>>, %arg23: memref<4x8x8xf32, #tpu.memory_space<vmem>>) attributes {dimension_semantics = [#tpu.dimension_semantics<parallel>, #tpu.dimension_semantics<arbitrary>], iteration_bounds = array<i64: 2, 1>, scalar_prefetch = 0 : i64, scratch_operands = 2 : i64, tpu.core_type = #tpu.core_type<tc>, window_params = [{transform_indices = @transform_0, window_bounds = array<i64: 1, 8, 32>}, {transform_indices = @transform_1, window_bounds = array<i64: 1, 8, 32>}, {transform_indices = @transform_2, window_bounds = array<i64: 1, 1, 8>}, {pipeline_mode = #tpu.pipeline_mode<synchronous>, transform_indices = @transform_3, window_bounds = array<i64: 4, 32, 8>}, {pipeline_mode = #tpu.pipeline_mode<synchronous>, transform_indices = @transform_4, window_bounds = array<i64: 4, 1, 8>}, {pipeline_mode = #tpu.pipeline_mode<synchronous>, transform_indices = @transform_5, window_bounds = array<i64: 4, 32, 8>}, {pipeline_mode = #tpu.pipeline_mode<synchronous>, transform_indices = @transform_6, window_bounds = array<i64: 4, 1, 8>}, {pipeline_mode = #tpu.pipeline_mode<synchronous>, transform_indices = @transform_7, window_bounds = array<i64: 4, 32, 8>}, {pipeline_mode = #tpu.pipeline_mode<synchronous>, transform_indices = @transform_8, window_bounds = array<i64: 4, 1, 8>}, {pipeline_mode = #tpu.pipeline_mode<synchronous>, transform_indices = @transform_9, window_bounds = array<i64: 4, 8, 32>}, {pipeline_mode = #tpu.pipeline_mode<synchronous>, transform_indices = @transform_10, window_bounds = array<i64: 1, 32>}, {pipeline_mode = #tpu.pipeline_mode<synchronous>, transform_indices = @transform_11, window_bounds = array<i64: 1, 32>}, {pipeline_mode = #tpu.pipeline_mode<synchronous>, transform_indices = @transform_12, window_bounds = array<i64: 1, 32>}, {pipeline_mode = #tpu.pipeline_mode<synchronous>, transform_indices = @transform_13, window_bounds = array<i64: 32, 64>}, {pipeline_mode = #tpu.pipeline_mode<synchronous>, transform_indices = @transform_14, window_bounds = array<i64: 1, 64>}, {pipeline_mode = #tpu.pipeline_mode<synchronous>, transform_indices = @transform_15, window_bounds = array<i64: 64, 32>}, {pipeline_mode = #tpu.pipeline_mode<synchronous>, transform_indices = @transform_16, window_bounds = array<i64: 1, 32>}, {pipeline_mode = #tpu.pipeline_mode<synchronous>, transform_indices = @transform_17, window_bounds = array<i64: 1, 32>}, {pipeline_mode = #tpu.pipeline_mode<synchronous>, transform_indices = @transform_18, window_bounds = array<i64: 1, 32>}, {transform_indices = @transform_19, window_bounds = array<i64: 1, 8, 32>}]} {
    %c0_i32 = arith.constant 0 : i32
    %0 = arith.cmpi eq, %arg1, %c0_i32 : i32
    %1 = arith.extui %0 : i1 to i32
    %c0_i32_0 = arith.constant 0 : i32
    %2 = arith.cmpi ne, %1, %c0_i32_0 : i32
    scf.if %2 {
      %c0_121 = arith.constant 0 : index
      %c0_122 = arith.constant 0 : index
      %c0_123 = arith.constant 0 : index
      %206 = vector.load %arg3[%c0_121, %c0_122, %c0_123] : memref<1x8x32xf32, #tpu.memory_space<vmem>>, vector<1x8x32xf32>
      %207 = vector.shape_cast %206 : vector<1x8x32xf32> to vector<8x32xf32>
      %c0_124 = arith.constant 0 : index
      %c0_125 = arith.constant 0 : index
      %c0_126 = arith.constant 0 : index
      %208 = vector.load %arg7[%c0_124, %c0_125, %c0_126] : memref<4x32x8xf32, #tpu.memory_space<vmem>>, vector<1x32x8xf32>
      %209 = vector.shape_cast %208 : vector<1x32x8xf32> to vector<32x8xf32>
      %cst_127 = arith.constant dense<0.000000e+00> : vector<8x8xf32>
      %210 = tpu.matmul %207, %209, %cst_127 {dimension_numbers = #tpu.dot_dimension_numbers<[1], [0], [0], [1], [0, 0, 1, 1], [], []>} : vector<8x32xf32>, vector<32x8xf32>, vector<8x8xf32> -> vector<8x8xf32>
      %c0_128 = arith.constant 0 : index
      %c0_129 = arith.constant 0 : index
      %c0_130 = arith.constant 0 : index
      %211 = vector.load %arg8[%c0_128, %c0_129, %c0_130] : memref<4x1x8xf32, #tpu.memory_space<vmem>>, vector<1x1x8xf32>
      %212 = vector.shape_cast %211 : vector<1x1x8xf32> to vector<1x8xf32>
      %213 = vector.broadcast %212 : vector<1x8xf32> to vector<8x8xf32>
      %214 = arith.addf %210, %213 : vector<8x8xf32>
      %c0_131 = arith.constant 0 : index
      %c0_132 = arith.constant 0 : index
      %c0_133 = arith.constant 0 : index
      %215 = vector.load %arg22[%c0_131, %c0_132, %c0_133] : memref<4x8x8xf32, #tpu.memory_space<vmem>>, vector<1x8x8xf32>
      %216 = vector.shape_cast %215 : vector<1x8x8xf32> to vector<8x8xf32>
      %217 = vector.shape_cast %214 : vector<8x8xf32> to vector<1x8x8xf32>
      tpu.vector_store %arg22[%c0_131, %c0_132, %c0_133], %217 {strides = array<i32>} : memref<4x8x8xf32, #tpu.memory_space<vmem>>, vector<1x8x8xf32>,
      %c0_134 = arith.constant 0 : index
      %c0_135 = arith.constant 0 : index
      %c0_136 = arith.constant 0 : index
      %218 = vector.load %arg9[%c0_134, %c0_135, %c0_136] : memref<4x32x8xf32, #tpu.memory_space<vmem>>, vector<1x32x8xf32>
      %219 = vector.shape_cast %218 : vector<1x32x8xf32> to vector<32x8xf32>
      %cst_137 = arith.constant dense<0.000000e+00> : vector<8x8xf32>
      %220 = tpu.matmul %207, %219, %cst_137 {dimension_numbers = #tpu.dot_dimension_numbers<[1], [0], [0], [1], [0, 0, 1, 1], [], []>} : vector<8x32xf32>, vector<32x8xf32>, vector<8x8xf32> -> vector<8x8xf32>
      %c0_138 = arith.constant 0 : index
      %c0_139 = arith.constant 0 : index
      %c0_140 = arith.constant 0 : index
      %221 = vector.load %arg10[%c0_138, %c0_139, %c0_140] : memref<4x1x8xf32, #tpu.memory_space<vmem>>, vector<1x1x8xf32>
      %222 = vector.shape_cast %221 : vector<1x1x8xf32> to vector<1x8xf32>
      %223 = vector.broadcast %222 : vector<1x8xf32> to vector<8x8xf32>
      %224 = arith.addf %220, %223 : vector<8x8xf32>
      %c0_141 = arith.constant 0 : index
      %c0_142 = arith.constant 0 : index
      %c0_143 = arith.constant 0 : index
      %225 = vector.load %arg23[%c0_141, %c0_142, %c0_143] : memref<4x8x8xf32, #tpu.memory_space<vmem>>, vector<1x8x8xf32>
      %226 = vector.shape_cast %225 : vector<1x8x8xf32> to vector<8x8xf32>
      %227 = vector.shape_cast %224 : vector<8x8xf32> to vector<1x8x8xf32>
      tpu.vector_store %arg23[%c0_141, %c0_142, %c0_143], %227 {strides = array<i32>} : memref<4x8x8xf32, #tpu.memory_space<vmem>>, vector<1x8x8xf32>,
      %c1_144 = arith.constant 1 : index
      %c0_145 = arith.constant 0 : index
      %c0_146 = arith.constant 0 : index
      %228 = vector.load %arg7[%c1_144, %c0_145, %c0_146] : memref<4x32x8xf32, #tpu.memory_space<vmem>>, vector<1x32x8xf32>
      %229 = vector.shape_cast %228 : vector<1x32x8xf32> to vector<32x8xf32>
      %cst_147 = arith.constant dense<0.000000e+00> : vector<8x8xf32>
      %230 = tpu.matmul %207, %229, %cst_147 {dimension_numbers = #tpu.dot_dimension_numbers<[1], [0], [0], [1], [0, 0, 1, 1], [], []>} : vector<8x32xf32>, vector<32x8xf32>, vector<8x8xf32> -> vector<8x8xf32>
      %c1_148 = arith.constant 1 : index
      %c0_149 = arith.constant 0 : index
      %c0_150 = arith.constant 0 : index
      %231 = vector.load %arg8[%c1_148, %c0_149, %c0_150] : memref<4x1x8xf32, #tpu.memory_space<vmem>>, vector<1x1x8xf32>
      %232 = vector.shape_cast %231 : vector<1x1x8xf32> to vector<1x8xf32>
      %233 = vector.broadcast %232 : vector<1x8xf32> to vector<8x8xf32>
      %234 = arith.addf %230, %233 : vector<8x8xf32>
      %c1_151 = arith.constant 1 : index
      %c0_152 = arith.constant 0 : index
      %c0_153 = arith.constant 0 : index
      %235 = vector.load %arg22[%c1_151, %c0_152, %c0_153] : memref<4x8x8xf32, #tpu.memory_space<vmem>>, vector<1x8x8xf32>
      %236 = vector.shape_cast %235 : vector<1x8x8xf32> to vector<8x8xf32>
      %237 = vector.shape_cast %234 : vector<8x8xf32> to vector<1x8x8xf32>
      tpu.vector_store %arg22[%c1_151, %c0_152, %c0_153], %237 {strides = array<i32>} : memref<4x8x8xf32, #tpu.memory_space<vmem>>, vector<1x8x8xf32>,
      %c1_154 = arith.constant 1 : index
      %c0_155 = arith.constant 0 : index
      %c0_156 = arith.constant 0 : index
      %238 = vector.load %arg9[%c1_154, %c0_155, %c0_156] : memref<4x32x8xf32, #tpu.memory_space<vmem>>, vector<1x32x8xf32>
      %239 = vector.shape_cast %238 : vector<1x32x8xf32> to vector<32x8xf32>
      %cst_157 = arith.constant dense<0.000000e+00> : vector<8x8xf32>
      %240 = tpu.matmul %207, %239, %cst_157 {dimension_numbers = #tpu.dot_dimension_numbers<[1], [0], [0], [1], [0, 0, 1, 1], [], []>} : vector<8x32xf32>, vector<32x8xf32>, vector<8x8xf32> -> vector<8x8xf32>
      %c1_158 = arith.constant 1 : index
      %c0_159 = arith.constant 0 : index
      %c0_160 = arith.constant 0 : index
      %241 = vector.load %arg10[%c1_158, %c0_159, %c0_160] : memref<4x1x8xf32, #tpu.memory_space<vmem>>, vector<1x1x8xf32>
      %242 = vector.shape_cast %241 : vector<1x1x8xf32> to vector<1x8xf32>
      %243 = vector.broadcast %242 : vector<1x8xf32> to vector<8x8xf32>
      %244 = arith.addf %240, %243 : vector<8x8xf32>
      %c1_161 = arith.constant 1 : index
      %c0_162 = arith.constant 0 : index
      %c0_163 = arith.constant 0 : index
      %245 = vector.load %arg23[%c1_161, %c0_162, %c0_163] : memref<4x8x8xf32, #tpu.memory_space<vmem>>, vector<1x8x8xf32>
      %246 = vector.shape_cast %245 : vector<1x8x8xf32> to vector<8x8xf32>
      %247 = vector.shape_cast %244 : vector<8x8xf32> to vector<1x8x8xf32>
      tpu.vector_store %arg23[%c1_161, %c0_162, %c0_163], %247 {strides = array<i32>} : memref<4x8x8xf32, #tpu.memory_space<vmem>>, vector<1x8x8xf32>,
      %c2_164 = arith.constant 2 : index
      %c0_165 = arith.constant 0 : index
      %c0_166 = arith.constant 0 : index
      %248 = vector.load %arg7[%c2_164, %c0_165, %c0_166] : memref<4x32x8xf32, #tpu.memory_space<vmem>>, vector<1x32x8xf32>
      %249 = vector.shape_cast %248 : vector<1x32x8xf32> to vector<32x8xf32>
      %cst_167 = arith.constant dense<0.000000e+00> : vector<8x8xf32>
      %250 = tpu.matmul %207, %249, %cst_167 {dimension_numbers = #tpu.dot_dimension_numbers<[1], [0], [0], [1], [0, 0, 1, 1], [], []>} : vector<8x32xf32>, vector<32x8xf32>, vector<8x8xf32> -> vector<8x8xf32>
      %c2_168 = arith.constant 2 : index
      %c0_169 = arith.constant 0 : index
      %c0_170 = arith.constant 0 : index
      %251 = vector.load %arg8[%c2_168, %c0_169, %c0_170] : memref<4x1x8xf32, #tpu.memory_space<vmem>>, vector<1x1x8xf32>
      %252 = vector.shape_cast %251 : vector<1x1x8xf32> to vector<1x8xf32>
      %253 = vector.broadcast %252 : vector<1x8xf32> to vector<8x8xf32>
      %254 = arith.addf %250, %253 : vector<8x8xf32>
      %c2_171 = arith.constant 2 : index
      %c0_172 = arith.constant 0 : index
      %c0_173 = arith.constant 0 : index
      %255 = vector.load %arg22[%c2_171, %c0_172, %c0_173] : memref<4x8x8xf32, #tpu.memory_space<vmem>>, vector<1x8x8xf32>
      %256 = vector.shape_cast %255 : vector<1x8x8xf32> to vector<8x8xf32>
      %257 = vector.shape_cast %254 : vector<8x8xf32> to vector<1x8x8xf32>
      tpu.vector_store %arg22[%c2_171, %c0_172, %c0_173], %257 {strides = array<i32>} : memref<4x8x8xf32, #tpu.memory_space<vmem>>, vector<1x8x8xf32>,
      %c2_174 = arith.constant 2 : index
      %c0_175 = arith.constant 0 : index
      %c0_176 = arith.constant 0 : index
      %258 = vector.load %arg9[%c2_174, %c0_175, %c0_176] : memref<4x32x8xf32, #tpu.memory_space<vmem>>, vector<1x32x8xf32>
      %259 = vector.shape_cast %258 : vector<1x32x8xf32> to vector<32x8xf32>
      %cst_177 = arith.constant dense<0.000000e+00> : vector<8x8xf32>
      %260 = tpu.matmul %207, %259, %cst_177 {dimension_numbers = #tpu.dot_dimension_numbers<[1], [0], [0], [1], [0, 0, 1, 1], [], []>} : vector<8x32xf32>, vector<32x8xf32>, vector<8x8xf32> -> vector<8x8xf32>
      %c2_178 = arith.constant 2 : index
      %c0_179 = arith.constant 0 : index
      %c0_180 = arith.constant 0 : index
      %261 = vector.load %arg10[%c2_178, %c0_179, %c0_180] : memref<4x1x8xf32, #tpu.memory_space<vmem>>, vector<1x1x8xf32>
      %262 = vector.shape_cast %261 : vector<1x1x8xf32> to vector<1x8xf32>
      %263 = vector.broadcast %262 : vector<1x8xf32> to vector<8x8xf32>
      %264 = arith.addf %260, %263 : vector<8x8xf32>
      %c2_181 = arith.constant 2 : index
      %c0_182 = arith.constant 0 : index
      %c0_183 = arith.constant 0 : index
      %265 = vector.load %arg23[%c2_181, %c0_182, %c0_183] : memref<4x8x8xf32, #tpu.memory_space<vmem>>, vector<1x8x8xf32>
      %266 = vector.shape_cast %265 : vector<1x8x8xf32> to vector<8x8xf32>
      %267 = vector.shape_cast %264 : vector<8x8xf32> to vector<1x8x8xf32>
      tpu.vector_store %arg23[%c2_181, %c0_182, %c0_183], %267 {strides = array<i32>} : memref<4x8x8xf32, #tpu.memory_space<vmem>>, vector<1x8x8xf32>,
      %c3_184 = arith.constant 3 : index
      %c0_185 = arith.constant 0 : index
      %c0_186 = arith.constant 0 : index
      %268 = vector.load %arg7[%c3_184, %c0_185, %c0_186] : memref<4x32x8xf32, #tpu.memory_space<vmem>>, vector<1x32x8xf32>
      %269 = vector.shape_cast %268 : vector<1x32x8xf32> to vector<32x8xf32>
      %cst_187 = arith.constant dense<0.000000e+00> : vector<8x8xf32>
      %270 = tpu.matmul %207, %269, %cst_187 {dimension_numbers = #tpu.dot_dimension_numbers<[1], [0], [0], [1], [0, 0, 1, 1], [], []>} : vector<8x32xf32>, vector<32x8xf32>, vector<8x8xf32> -> vector<8x8xf32>
      %c3_188 = arith.constant 3 : index
      %c0_189 = arith.constant 0 : index
      %c0_190 = arith.constant 0 : index
      %271 = vector.load %arg8[%c3_188, %c0_189, %c0_190] : memref<4x1x8xf32, #tpu.memory_space<vmem>>, vector<1x1x8xf32>
      %272 = vector.shape_cast %271 : vector<1x1x8xf32> to vector<1x8xf32>
      %273 = vector.broadcast %272 : vector<1x8xf32> to vector<8x8xf32>
      %274 = arith.addf %270, %273 : vector<8x8xf32>
      %c3_191 = arith.constant 3 : index
      %c0_192 = arith.constant 0 : index
      %c0_193 = arith.constant 0 : index
      %275 = vector.load %arg22[%c3_191, %c0_192, %c0_193] : memref<4x8x8xf32, #tpu.memory_space<vmem>>, vector<1x8x8xf32>
      %276 = vector.shape_cast %275 : vector<1x8x8xf32> to vector<8x8xf32>
      %277 = vector.shape_cast %274 : vector<8x8xf32> to vector<1x8x8xf32>
      tpu.vector_store %arg22[%c3_191, %c0_192, %c0_193], %277 {strides = array<i32>} : memref<4x8x8xf32, #tpu.memory_space<vmem>>, vector<1x8x8xf32>,
      %c3_194 = arith.constant 3 : index
      %c0_195 = arith.constant 0 : index
      %c0_196 = arith.constant 0 : index
      %278 = vector.load %arg9[%c3_194, %c0_195, %c0_196] : memref<4x32x8xf32, #tpu.memory_space<vmem>>, vector<1x32x8xf32>
      %279 = vector.shape_cast %278 : vector<1x32x8xf32> to vector<32x8xf32>
      %cst_197 = arith.constant dense<0.000000e+00> : vector<8x8xf32>
      %280 = tpu.matmul %207, %279, %cst_197 {dimension_numbers = #tpu.dot_dimension_numbers<[1], [0], [0], [1], [0, 0, 1, 1], [], []>} : vector<8x32xf32>, vector<32x8xf32>, vector<8x8xf32> -> vector<8x8xf32>
      %c3_198 = arith.constant 3 : index
      %c0_199 = arith.constant 0 : index
      %c0_200 = arith.constant 0 : index
      %281 = vector.load %arg10[%c3_198, %c0_199, %c0_200] : memref<4x1x8xf32, #tpu.memory_space<vmem>>, vector<1x1x8xf32>
      %282 = vector.shape_cast %281 : vector<1x1x8xf32> to vector<1x8xf32>
      %283 = vector.broadcast %282 : vector<1x8xf32> to vector<8x8xf32>
      %284 = arith.addf %280, %283 : vector<8x8xf32>
      %c3_201 = arith.constant 3 : index
      %c0_202 = arith.constant 0 : index
      %c0_203 = arith.constant 0 : index
      %285 = vector.load %arg23[%c3_201, %c0_202, %c0_203] : memref<4x8x8xf32, #tpu.memory_space<vmem>>, vector<1x8x8xf32>
      %286 = vector.shape_cast %285 : vector<1x8x8xf32> to vector<8x8xf32>
      %287 = vector.shape_cast %284 : vector<8x8xf32> to vector<1x8x8xf32>
      tpu.vector_store %arg23[%c3_201, %c0_202, %c0_203], %287 {strides = array<i32>} : memref<4x8x8xf32, #tpu.memory_space<vmem>>, vector<1x8x8xf32>,
    } else {
    }
    %c0 = arith.constant 0 : index
    %c0_1 = arith.constant 0 : index
    %c0_2 = arith.constant 0 : index
    %3 = vector.load %arg2[%c0, %c0_1, %c0_2] : memref<1x8x32xf32, #tpu.memory_space<vmem>>, vector<1x8x32xf32>
    %4 = vector.shape_cast %3 : vector<1x8x32xf32> to vector<8x32xf32>
    %c0_3 = arith.constant 0 : index
    %c0_4 = arith.constant 0 : index
    %c0_5 = arith.constant 0 : index
    %5 = vector.load %arg4[%c0_3, %c0_4, %c0_5] : memref<1x1x8xf32, #tpu.memory_space<vmem>>, vector<1x1x8xf32>
    %6 = vector.shape_cast %5 : vector<1x1x8xf32> to vector<1x8xf32>
    %cst = arith.constant 0.000000e+00 : f32
    %7 = vector.broadcast %cst : f32 to vector<8x32xf32>
    %c0_6 = arith.constant 0 : index
    %c0_7 = arith.constant 0 : index
    %c0_8 = arith.constant 0 : index
    %8 = vector.load %arg5[%c0_6, %c0_7, %c0_8] : memref<4x32x8xf32, #tpu.memory_space<vmem>>, vector<1x32x8xf32>
    %9 = vector.shape_cast %8 : vector<1x32x8xf32> to vector<32x8xf32>
    %cst_9 = arith.constant dense<0.000000e+00> : vector<8x8xf32>
    %10 = tpu.matmul %4, %9, %cst_9 {dimension_numbers = #tpu.dot_dimension_numbers<[1], [0], [0], [1], [0, 0, 1, 1], [], []>} : vector<8x32xf32>, vector<32x8xf32>, vector<8x8xf32> -> vector<8x8xf32>
    %c0_10 = arith.constant 0 : index
    %c0_11 = arith.constant 0 : index
    %c0_12 = arith.constant 0 : index
    %11 = vector.load %arg6[%c0_10, %c0_11, %c0_12] : memref<4x1x8xf32, #tpu.memory_space<vmem>>, vector<1x1x8xf32>
    %12 = vector.shape_cast %11 : vector<1x1x8xf32> to vector<1x8xf32>
    %13 = vector.broadcast %12 : vector<1x8xf32> to vector<8x8xf32>
    %14 = arith.addf %10, %13 : vector<8x8xf32>
    %c0_13 = arith.constant 0 : index
    %c0_14 = arith.constant 0 : index
    %c0_15 = arith.constant 0 : index
    %15 = vector.load %arg22[%c0_13, %c0_14, %c0_15] : memref<4x8x8xf32, #tpu.memory_space<vmem>>, vector<1x8x8xf32>
    %16 = vector.shape_cast %15 : vector<1x8x8xf32> to vector<8x8xf32>
    %cst_16 = arith.constant dense<0.000000e+00> : vector<8x8xf32>
    %17 = tpu.matmul %14, %16, %cst_16 {dimension_numbers = #tpu.dot_dimension_numbers<[1], [1], [0], [0], [0, 0, 1, 0], [], []>} : vector<8x8xf32>, vector<8x8xf32>, vector<8x8xf32> -> vector<8x8xf32>
    %18 = vector.broadcast %6 : vector<1x8xf32> to vector<8x8xf32>
    %19 = arith.addf %17, %18 : vector<8x8xf32>
    %cst_17 = arith.constant dense<0xFF800000> : vector<8xf32>
    %20 = vector.multi_reduction <maximumf>, %19, %cst_17 [1] : vector<8x8xf32> to vector<8xf32>
    %21 = vector.shape_cast %20 : vector<8xf32> to vector<8x1xf32>
    %22 = vector.broadcast %21 : vector<8x1xf32> to vector<8x8xf32>
    %23 = arith.subf %19, %22 : vector<8x8xf32>
    %24 = math.exp %23 : vector<8x8xf32>
    %cst_18 = arith.constant dense<0.000000e+00> : vector<8xf32>
    %25 = vector.multi_reduction <add>, %24, %cst_18 [1] : vector<8x8xf32> to vector<8xf32>
    %26 = vector.shape_cast %25 : vector<8xf32> to vector<8x1xf32>
    %27 = tpu.reciprocal %26 : vector<8x1xf32> -> vector<8x1xf32>
    %28 = vector.broadcast %27 : vector<8x1xf32> to vector<8x8xf32>
    %29 = arith.mulf %24, %28 : vector<8x8xf32>
    %c0_19 = arith.constant 0 : index
    %c0_20 = arith.constant 0 : index
    %c0_21 = arith.constant 0 : index
    %30 = vector.load %arg23[%c0_19, %c0_20, %c0_21] : memref<4x8x8xf32, #tpu.memory_space<vmem>>, vector<1x8x8xf32>
    %31 = vector.shape_cast %30 : vector<1x8x8xf32> to vector<8x8xf32>
    %cst_22 = arith.constant dense<0.000000e+00> : vector<8x8xf32>
    %32 = tpu.matmul %29, %31, %cst_22 {dimension_numbers = #tpu.dot_dimension_numbers<[1], [0], [0], [1], [0, 0, 1, 1], [], []>} : vector<8x8xf32>, vector<8x8xf32>, vector<8x8xf32> -> vector<8x8xf32>
    %c0_23 = arith.constant 0 : index
    %c0_24 = arith.constant 0 : index
    %c0_25 = arith.constant 0 : index
    %33 = vector.load %arg11[%c0_23, %c0_24, %c0_25] : memref<4x8x32xf32, #tpu.memory_space<vmem>>, vector<1x8x32xf32>
    %34 = vector.shape_cast %33 : vector<1x8x32xf32> to vector<8x32xf32>
    %cst_26 = arith.constant dense<0.000000e+00> : vector<8x32xf32>
    %35 = tpu.matmul %32, %34, %cst_26 {dimension_numbers = #tpu.dot_dimension_numbers<[1], [0], [0], [1], [0, 0, 1, 1], [], []>} : vector<8x8xf32>, vector<8x32xf32>, vector<8x32xf32> -> vector<8x32xf32>
    %36 = arith.addf %7, %35 : vector<8x32xf32>
    %c1 = arith.constant 1 : index
    %c0_27 = arith.constant 0 : index
    %c0_28 = arith.constant 0 : index
    %37 = vector.load %arg5[%c1, %c0_27, %c0_28] : memref<4x32x8xf32, #tpu.memory_space<vmem>>, vector<1x32x8xf32>
    %38 = vector.shape_cast %37 : vector<1x32x8xf32> to vector<32x8xf32>
    %cst_29 = arith.constant dense<0.000000e+00> : vector<8x8xf32>
    %39 = tpu.matmul %4, %38, %cst_29 {dimension_numbers = #tpu.dot_dimension_numbers<[1], [0], [0], [1], [0, 0, 1, 1], [], []>} : vector<8x32xf32>, vector<32x8xf32>, vector<8x8xf32> -> vector<8x8xf32>
    %c1_30 = arith.constant 1 : index
    %c0_31 = arith.constant 0 : index
    %c0_32 = arith.constant 0 : index
    %40 = vector.load %arg6[%c1_30, %c0_31, %c0_32] : memref<4x1x8xf32, #tpu.memory_space<vmem>>, vector<1x1x8xf32>
    %41 = vector.shape_cast %40 : vector<1x1x8xf32> to vector<1x8xf32>
    %42 = vector.broadcast %41 : vector<1x8xf32> to vector<8x8xf32>
    %43 = arith.addf %39, %42 : vector<8x8xf32>
    %c1_33 = arith.constant 1 : index
    %c0_34 = arith.constant 0 : index
    %c0_35 = arith.constant 0 : index
    %44 = vector.load %arg22[%c1_33, %c0_34, %c0_35] : memref<4x8x8xf32, #tpu.memory_space<vmem>>, vector<1x8x8xf32>
    %45 = vector.shape_cast %44 : vector<1x8x8xf32> to vector<8x8xf32>
    %cst_36 = arith.constant dense<0.000000e+00> : vector<8x8xf32>
    %46 = tpu.matmul %43, %45, %cst_36 {dimension_numbers = #tpu.dot_dimension_numbers<[1], [1], [0], [0], [0, 0, 1, 0], [], []>} : vector<8x8xf32>, vector<8x8xf32>, vector<8x8xf32> -> vector<8x8xf32>
    %47 = vector.broadcast %6 : vector<1x8xf32> to vector<8x8xf32>
    %48 = arith.addf %46, %47 : vector<8x8xf32>
    %cst_37 = arith.constant dense<0xFF800000> : vector<8xf32>
    %49 = vector.multi_reduction <maximumf>, %48, %cst_37 [1] : vector<8x8xf32> to vector<8xf32>
    %50 = vector.shape_cast %49 : vector<8xf32> to vector<8x1xf32>
    %51 = vector.broadcast %50 : vector<8x1xf32> to vector<8x8xf32>
    %52 = arith.subf %48, %51 : vector<8x8xf32>
    %53 = math.exp %52 : vector<8x8xf32>
    %cst_38 = arith.constant dense<0.000000e+00> : vector<8xf32>
    %54 = vector.multi_reduction <add>, %53, %cst_38 [1] : vector<8x8xf32> to vector<8xf32>
    %55 = vector.shape_cast %54 : vector<8xf32> to vector<8x1xf32>
    %56 = tpu.reciprocal %55 : vector<8x1xf32> -> vector<8x1xf32>
    %57 = vector.broadcast %56 : vector<8x1xf32> to vector<8x8xf32>
    %58 = arith.mulf %53, %57 : vector<8x8xf32>
    %c1_39 = arith.constant 1 : index
    %c0_40 = arith.constant 0 : index
    %c0_41 = arith.constant 0 : index
    %59 = vector.load %arg23[%c1_39, %c0_40, %c0_41] : memref<4x8x8xf32, #tpu.memory_space<vmem>>, vector<1x8x8xf32>
    %60 = vector.shape_cast %59 : vector<1x8x8xf32> to vector<8x8xf32>
    %cst_42 = arith.constant dense<0.000000e+00> : vector<8x8xf32>
    %61 = tpu.matmul %58, %60, %cst_42 {dimension_numbers = #tpu.dot_dimension_numbers<[1], [0], [0], [1], [0, 0, 1, 1], [], []>} : vector<8x8xf32>, vector<8x8xf32>, vector<8x8xf32> -> vector<8x8xf32>
    %c1_43 = arith.constant 1 : index
    %c0_44 = arith.constant 0 : index
    %c0_45 = arith.constant 0 : index
    %62 = vector.load %arg11[%c1_43, %c0_44, %c0_45] : memref<4x8x32xf32, #tpu.memory_space<vmem>>, vector<1x8x32xf32>
    %63 = vector.shape_cast %62 : vector<1x8x32xf32> to vector<8x32xf32>
    %cst_46 = arith.constant dense<0.000000e+00> : vector<8x32xf32>
    %64 = tpu.matmul %61, %63, %cst_46 {dimension_numbers = #tpu.dot_dimension_numbers<[1], [0], [0], [1], [0, 0, 1, 1], [], []>} : vector<8x8xf32>, vector<8x32xf32>, vector<8x32xf32> -> vector<8x32xf32>
    %65 = arith.addf %36, %64 : vector<8x32xf32>
    %c2 = arith.constant 2 : index
    %c0_47 = arith.constant 0 : index
    %c0_48 = arith.constant 0 : index
    %66 = vector.load %arg5[%c2, %c0_47, %c0_48] : memref<4x32x8xf32, #tpu.memory_space<vmem>>, vector<1x32x8xf32>
    %67 = vector.shape_cast %66 : vector<1x32x8xf32> to vector<32x8xf32>
    %cst_49 = arith.constant dense<0.000000e+00> : vector<8x8xf32>
    %68 = tpu.matmul %4, %67, %cst_49 {dimension_numbers = #tpu.dot_dimension_numbers<[1], [0], [0], [1], [0, 0, 1, 1], [], []>} : vector<8x32xf32>, vector<32x8xf32>, vector<8x8xf32> -> vector<8x8xf32>
    %c2_50 = arith.constant 2 : index
    %c0_51 = arith.constant 0 : index
    %c0_52 = arith.constant 0 : index
    %69 = vector.load %arg6[%c2_50, %c0_51, %c0_52] : memref<4x1x8xf32, #tpu.memory_space<vmem>>, vector<1x1x8xf32>
    %70 = vector.shape_cast %69 : vector<1x1x8xf32> to vector<1x8xf32>
    %71 = vector.broadcast %70 : vector<1x8xf32> to vector<8x8xf32>
    %72 = arith.addf %68, %71 : vector<8x8xf32>
    %c2_53 = arith.constant 2 : index
    %c0_54 = arith.constant 0 : index
    %c0_55 = arith.constant 0 : index
    %73 = vector.load %arg22[%c2_53, %c0_54, %c0_55] : memref<4x8x8xf32, #tpu.memory_space<vmem>>, vector<1x8x8xf32>
    %74 = vector.shape_cast %73 : vector<1x8x8xf32> to vector<8x8xf32>
    %cst_56 = arith.constant dense<0.000000e+00> : vector<8x8xf32>
    %75 = tpu.matmul %72, %74, %cst_56 {dimension_numbers = #tpu.dot_dimension_numbers<[1], [1], [0], [0], [0, 0, 1, 0], [], []>} : vector<8x8xf32>, vector<8x8xf32>, vector<8x8xf32> -> vector<8x8xf32>
    %76 = vector.broadcast %6 : vector<1x8xf32> to vector<8x8xf32>
    %77 = arith.addf %75, %76 : vector<8x8xf32>
    %cst_57 = arith.constant dense<0xFF800000> : vector<8xf32>
    %78 = vector.multi_reduction <maximumf>, %77, %cst_57 [1] : vector<8x8xf32> to vector<8xf32>
    %79 = vector.shape_cast %78 : vector<8xf32> to vector<8x1xf32>
    %80 = vector.broadcast %79 : vector<8x1xf32> to vector<8x8xf32>
    %81 = arith.subf %77, %80 : vector<8x8xf32>
    %82 = math.exp %81 : vector<8x8xf32>
    %cst_58 = arith.constant dense<0.000000e+00> : vector<8xf32>
    %83 = vector.multi_reduction <add>, %82, %cst_58 [1] : vector<8x8xf32> to vector<8xf32>
    %84 = vector.shape_cast %83 : vector<8xf32> to vector<8x1xf32>
    %85 = tpu.reciprocal %84 : vector<8x1xf32> -> vector<8x1xf32>
    %86 = vector.broadcast %85 : vector<8x1xf32> to vector<8x8xf32>
    %87 = arith.mulf %82, %86 : vector<8x8xf32>
    %c2_59 = arith.constant 2 : index
    %c0_60 = arith.constant 0 : index
    %c0_61 = arith.constant 0 : index
    %88 = vector.load %arg23[%c2_59, %c0_60, %c0_61] : memref<4x8x8xf32, #tpu.memory_space<vmem>>, vector<1x8x8xf32>
    %89 = vector.shape_cast %88 : vector<1x8x8xf32> to vector<8x8xf32>
    %cst_62 = arith.constant dense<0.000000e+00> : vector<8x8xf32>
    %90 = tpu.matmul %87, %89, %cst_62 {dimension_numbers = #tpu.dot_dimension_numbers<[1], [0], [0], [1], [0, 0, 1, 1], [], []>} : vector<8x8xf32>, vector<8x8xf32>, vector<8x8xf32> -> vector<8x8xf32>
    %c2_63 = arith.constant 2 : index
    %c0_64 = arith.constant 0 : index
    %c0_65 = arith.constant 0 : index
    %91 = vector.load %arg11[%c2_63, %c0_64, %c0_65] : memref<4x8x32xf32, #tpu.memory_space<vmem>>, vector<1x8x32xf32>
    %92 = vector.shape_cast %91 : vector<1x8x32xf32> to vector<8x32xf32>
    %cst_66 = arith.constant dense<0.000000e+00> : vector<8x32xf32>
    %93 = tpu.matmul %90, %92, %cst_66 {dimension_numbers = #tpu.dot_dimension_numbers<[1], [0], [0], [1], [0, 0, 1, 1], [], []>} : vector<8x8xf32>, vector<8x32xf32>, vector<8x32xf32> -> vector<8x32xf32>
    %94 = arith.addf %65, %93 : vector<8x32xf32>
    %c3 = arith.constant 3 : index
    %c0_67 = arith.constant 0 : index
    %c0_68 = arith.constant 0 : index
    %95 = vector.load %arg5[%c3, %c0_67, %c0_68] : memref<4x32x8xf32, #tpu.memory_space<vmem>>, vector<1x32x8xf32>
    %96 = vector.shape_cast %95 : vector<1x32x8xf32> to vector<32x8xf32>
    %cst_69 = arith.constant dense<0.000000e+00> : vector<8x8xf32>
    %97 = tpu.matmul %4, %96, %cst_69 {dimension_numbers = #tpu.dot_dimension_numbers<[1], [0], [0], [1], [0, 0, 1, 1], [], []>} : vector<8x32xf32>, vector<32x8xf32>, vector<8x8xf32> -> vector<8x8xf32>
    %c3_70 = arith.constant 3 : index
    %c0_71 = arith.constant 0 : index
    %c0_72 = arith.constant 0 : index
    %98 = vector.load %arg6[%c3_70, %c0_71, %c0_72] : memref<4x1x8xf32, #tpu.memory_space<vmem>>, vector<1x1x8xf32>
    %99 = vector.shape_cast %98 : vector<1x1x8xf32> to vector<1x8xf32>
    %100 = vector.broadcast %99 : vector<1x8xf32> to vector<8x8xf32>
    %101 = arith.addf %97, %100 : vector<8x8xf32>
    %c3_73 = arith.constant 3 : index
    %c0_74 = arith.constant 0 : index
    %c0_75 = arith.constant 0 : index
    %102 = vector.load %arg22[%c3_73, %c0_74, %c0_75] : memref<4x8x8xf32, #tpu.memory_space<vmem>>, vector<1x8x8xf32>
    %103 = vector.shape_cast %102 : vector<1x8x8xf32> to vector<8x8xf32>
    %cst_76 = arith.constant dense<0.000000e+00> : vector<8x8xf32>
    %104 = tpu.matmul %101, %103, %cst_76 {dimension_numbers = #tpu.dot_dimension_numbers<[1], [1], [0], [0], [0, 0, 1, 0], [], []>} : vector<8x8xf32>, vector<8x8xf32>, vector<8x8xf32> -> vector<8x8xf32>
    %105 = vector.broadcast %6 : vector<1x8xf32> to vector<8x8xf32>
    %106 = arith.addf %104, %105 : vector<8x8xf32>
    %cst_77 = arith.constant dense<0xFF800000> : vector<8xf32>
    %107 = vector.multi_reduction <maximumf>, %106, %cst_77 [1] : vector<8x8xf32> to vector<8xf32>
    %108 = vector.shape_cast %107 : vector<8xf32> to vector<8x1xf32>
    %109 = vector.broadcast %108 : vector<8x1xf32> to vector<8x8xf32>
    %110 = arith.subf %106, %109 : vector<8x8xf32>
    %111 = math.exp %110 : vector<8x8xf32>
    %cst_78 = arith.constant dense<0.000000e+00> : vector<8xf32>
    %112 = vector.multi_reduction <add>, %111, %cst_78 [1] : vector<8x8xf32> to vector<8xf32>
    %113 = vector.shape_cast %112 : vector<8xf32> to vector<8x1xf32>
    %114 = tpu.reciprocal %113 : vector<8x1xf32> -> vector<8x1xf32>
    %115 = vector.broadcast %114 : vector<8x1xf32> to vector<8x8xf32>
    %116 = arith.mulf %111, %115 : vector<8x8xf32>
    %c3_79 = arith.constant 3 : index
    %c0_80 = arith.constant 0 : index
    %c0_81 = arith.constant 0 : index
    %117 = vector.load %arg23[%c3_79, %c0_80, %c0_81] : memref<4x8x8xf32, #tpu.memory_space<vmem>>, vector<1x8x8xf32>
    %118 = vector.shape_cast %117 : vector<1x8x8xf32> to vector<8x8xf32>
    %cst_82 = arith.constant dense<0.000000e+00> : vector<8x8xf32>
    %119 = tpu.matmul %116, %118, %cst_82 {dimension_numbers = #tpu.dot_dimension_numbers<[1], [0], [0], [1], [0, 0, 1, 1], [], []>} : vector<8x8xf32>, vector<8x8xf32>, vector<8x8xf32> -> vector<8x8xf32>
    %c3_83 = arith.constant 3 : index
    %c0_84 = arith.constant 0 : index
    %c0_85 = arith.constant 0 : index
    %120 = vector.load %arg11[%c3_83, %c0_84, %c0_85] : memref<4x8x32xf32, #tpu.memory_space<vmem>>, vector<1x8x32xf32>
    %121 = vector.shape_cast %120 : vector<1x8x32xf32> to vector<8x32xf32>
    %cst_86 = arith.constant dense<0.000000e+00> : vector<8x32xf32>
    %122 = tpu.matmul %119, %121, %cst_86 {dimension_numbers = #tpu.dot_dimension_numbers<[1], [0], [0], [1], [0, 0, 1, 1], [], []>} : vector<8x8xf32>, vector<8x32xf32>, vector<8x32xf32> -> vector<8x32xf32>
    %123 = arith.addf %94, %122 : vector<8x32xf32>
    %c0_87 = arith.constant 0 : index
    %c0_88 = arith.constant 0 : index
    %124 = vector.load %arg12[%c0_87, %c0_88] : memref<1x32xf32, #tpu.memory_space<vmem>>, vector<1x32xf32>
    %125 = vector.shape_cast %124 : vector<1x32xf32> to vector<32xf32>
    %126 = vector.shape_cast %125 : vector<32xf32> to vector<1x32xf32>
    %127 = vector.broadcast %126 : vector<1x32xf32> to vector<8x32xf32>
    %128 = arith.addf %123, %127 : vector<8x32xf32>
    %129 = arith.addf %4, %128 : vector<8x32xf32>
    %cst_89 = arith.constant dense<0.000000e+00> : vector<8xf32>
    %130 = vector.multi_reduction <add>, %129, %cst_89 [1] : vector<8x32xf32> to vector<8xf32>
    %131 = vector.shape_cast %130 : vector<8xf32> to vector<8x1xf32>
    %cst_90 = arith.constant 3.200000e+01 : f32
    %132 = vector.broadcast %cst_90 : f32 to vector<8x1xf32>
    %133 = arith.divf %131, %132 : vector<8x1xf32>
    %134 = vector.broadcast %133 : vector<8x1xf32> to vector<8x32xf32>
    %135 = arith.subf %129, %134 : vector<8x32xf32>
    %136 = arith.mulf %135, %135 : vector<8x32xf32>
    %cst_91 = arith.constant dense<0.000000e+00> : vector<8xf32>
    %137 = vector.multi_reduction <add>, %136, %cst_91 [1] : vector<8x32xf32> to vector<8xf32>
    %138 = vector.shape_cast %137 : vector<8xf32> to vector<8x1xf32>
    %cst_92 = arith.constant 3.200000e+01 : f32
    %139 = vector.broadcast %cst_92 : f32 to vector<8x1xf32>
    %140 = arith.divf %138, %139 : vector<8x1xf32>
    %141 = vector.broadcast %133 : vector<8x1xf32> to vector<8x32xf32>
    %142 = arith.subf %129, %141 : vector<8x32xf32>
    %cst_93 = arith.constant 9.99999974E-6 : f32
    %143 = vector.broadcast %cst_93 : f32 to vector<8x1xf32>
    %144 = arith.addf %140, %143 : vector<8x1xf32>
    %145 = math.rsqrt %144 : vector<8x1xf32>
    %146 = vector.broadcast %145 : vector<8x1xf32> to vector<8x32xf32>
    %147 = arith.mulf %142, %146 : vector<8x32xf32>
    %c0_94 = arith.constant 0 : index
    %c0_95 = arith.constant 0 : index
    %148 = vector.load %arg13[%c0_94, %c0_95] : memref<1x32xf32, #tpu.memory_space<vmem>>, vector<1x32xf32>
    %149 = vector.shape_cast %148 : vector<1x32xf32> to vector<32xf32>
    %150 = vector.shape_cast %149 : vector<32xf32> to vector<1x32xf32>
    %151 = vector.broadcast %150 : vector<1x32xf32> to vector<8x32xf32>
    %152 = arith.mulf %147, %151 : vector<8x32xf32>
    %c0_96 = arith.constant 0 : index
    %c0_97 = arith.constant 0 : index
    %153 = vector.load %arg14[%c0_96, %c0_97] : memref<1x32xf32, #tpu.memory_space<vmem>>, vector<1x32xf32>
    %154 = vector.shape_cast %153 : vector<1x32xf32> to vector<32xf32>
    %155 = vector.shape_cast %154 : vector<32xf32> to vector<1x32xf32>
    %156 = vector.broadcast %155 : vector<1x32xf32> to vector<8x32xf32>
    %157 = arith.addf %152, %156 : vector<8x32xf32>
    %c0_98 = arith.constant 0 : index
    %c0_99 = arith.constant 0 : index
    %158 = vector.load %arg15[%c0_98, %c0_99] : memref<32x64xf32, #tpu.memory_space<vmem>>, vector<32x64xf32>
    %cst_100 = arith.constant dense<0.000000e+00> : vector<8x64xf32>
    %159 = tpu.matmul %157, %158, %cst_100 {dimension_numbers = #tpu.dot_dimension_numbers<[1], [0], [0], [1], [0, 0, 1, 1], [], []>} : vector<8x32xf32>, vector<32x64xf32>, vector<8x64xf32> -> vector<8x64xf32>
    %c0_101 = arith.constant 0 : index
    %c0_102 = arith.constant 0 : index
    %160 = vector.load %arg16[%c0_101, %c0_102] : memref<1x64xf32, #tpu.memory_space<vmem>>, vector<1x64xf32>
    %161 = vector.shape_cast %160 : vector<1x64xf32> to vector<64xf32>
    %162 = vector.shape_cast %161 : vector<64xf32> to vector<1x64xf32>
    %163 = vector.broadcast %162 : vector<1x64xf32> to vector<8x64xf32>
    %164 = arith.addf %159, %163 : vector<8x64xf32>
    %cst_103 = arith.constant 0.000000e+00 : f32
    %165 = vector.broadcast %cst_103 : f32 to vector<8x64xf32>
    %166 = arith.maximumf %164, %165 : vector<8x64xf32>
    %c0_104 = arith.constant 0 : index
    %c0_105 = arith.constant 0 : index
    %167 = vector.load %arg17[%c0_104, %c0_105] : memref<64x32xf32, #tpu.memory_space<vmem>>, vector<64x32xf32>
    %cst_106 = arith.constant dense<0.000000e+00> : vector<8x32xf32>
    %168 = tpu.matmul %166, %167, %cst_106 {dimension_numbers = #tpu.dot_dimension_numbers<[1], [0], [0], [1], [0, 0, 1, 1], [], []>} : vector<8x64xf32>, vector<64x32xf32>, vector<8x32xf32> -> vector<8x32xf32>
    %c0_107 = arith.constant 0 : index
    %c0_108 = arith.constant 0 : index
    %169 = vector.load %arg18[%c0_107, %c0_108] : memref<1x32xf32, #tpu.memory_space<vmem>>, vector<1x32xf32>
    %170 = vector.shape_cast %169 : vector<1x32xf32> to vector<32xf32>
    %171 = vector.shape_cast %170 : vector<32xf32> to vector<1x32xf32>
    %172 = vector.broadcast %171 : vector<1x32xf32> to vector<8x32xf32>
    %173 = arith.addf %168, %172 : vector<8x32xf32>
    %174 = arith.addf %157, %173 : vector<8x32xf32>
    %cst_109 = arith.constant dense<0.000000e+00> : vector<8xf32>
    %175 = vector.multi_reduction <add>, %174, %cst_109 [1] : vector<8x32xf32> to vector<8xf32>
    %176 = vector.shape_cast %175 : vector<8xf32> to vector<8x1xf32>
    %cst_110 = arith.constant 3.200000e+01 : f32
    %177 = vector.broadcast %cst_110 : f32 to vector<8x1xf32>
    %178 = arith.divf %176, %177 : vector<8x1xf32>
    %179 = vector.broadcast %178 : vector<8x1xf32> to vector<8x32xf32>
    %180 = arith.subf %174, %179 : vector<8x32xf32>
    %181 = arith.mulf %180, %180 : vector<8x32xf32>
    %cst_111 = arith.constant dense<0.000000e+00> : vector<8xf32>
    %182 = vector.multi_reduction <add>, %181, %cst_111 [1] : vector<8x32xf32> to vector<8xf32>
    %183 = vector.shape_cast %182 : vector<8xf32> to vector<8x1xf32>
    %cst_112 = arith.constant 3.200000e+01 : f32
    %184 = vector.broadcast %cst_112 : f32 to vector<8x1xf32>
    %185 = arith.divf %183, %184 : vector<8x1xf32>
    %186 = vector.broadcast %178 : vector<8x1xf32> to vector<8x32xf32>
    %187 = arith.subf %174, %186 : vector<8x32xf32>
    %cst_113 = arith.constant 9.99999974E-6 : f32
    %188 = vector.broadcast %cst_113 : f32 to vector<8x1xf32>
    %189 = arith.addf %185, %188 : vector<8x1xf32>
    %190 = math.rsqrt %189 : vector<8x1xf32>
    %191 = vector.broadcast %190 : vector<8x1xf32> to vector<8x32xf32>
    %192 = arith.mulf %187, %191 : vector<8x32xf32>
    %c0_114 = arith.constant 0 : index
    %c0_115 = arith.constant 0 : index
    %193 = vector.load %arg19[%c0_114, %c0_115] : memref<1x32xf32, #tpu.memory_space<vmem>>, vector<1x32xf32>
    %194 = vector.shape_cast %193 : vector<1x32xf32> to vector<32xf32>
    %195 = vector.shape_cast %194 : vector<32xf32> to vector<1x32xf32>
    %196 = vector.broadcast %195 : vector<1x32xf32> to vector<8x32xf32>
    %197 = arith.mulf %192, %196 : vector<8x32xf32>
    %c0_116 = arith.constant 0 : index
    %c0_117 = arith.constant 0 : index
    %198 = vector.load %arg20[%c0_116, %c0_117] : memref<1x32xf32, #tpu.memory_space<vmem>>, vector<1x32xf32>
    %199 = vector.shape_cast %198 : vector<1x32xf32> to vector<32xf32>
    %200 = vector.shape_cast %199 : vector<32xf32> to vector<1x32xf32>
    %201 = vector.broadcast %200 : vector<1x32xf32> to vector<8x32xf32>
    %202 = arith.addf %197, %201 : vector<8x32xf32>
    %c0_118 = arith.constant 0 : index
    %c0_119 = arith.constant 0 : index
    %c0_120 = arith.constant 0 : index
    %203 = vector.load %arg21[%c0_118, %c0_119, %c0_120] : memref<1x8x32xf32, #tpu.memory_space<vmem>>, vector<1x8x32xf32>
    %204 = vector.shape_cast %203 : vector<1x8x32xf32> to vector<8x32xf32>
    %205 = vector.shape_cast %202 : vector<8x32xf32> to vector<1x8x32xf32>
    tpu.vector_store %arg21[%c0_118, %c0_119, %c0_120], %205 {strides = array<i32>} : memref<1x8x32xf32, #tpu.memory_space<vmem>>, vector<1x8x32xf32>,
    return
  }
  func.func @transform_0(%arg0: i32, %arg1: i32) -> (i32, i32, i32) {
    %c0_i32 = arith.constant 0 : i32
    %c0_i32_0 = arith.constant 0 : i32
    return %arg0, %arg1, %c0_i32 : i32, i32, i32
  }
  func.func @transform_1(%arg0: i32, %arg1: i32) -> (i32, i32, i32) {
    %c0_i32 = arith.constant 0 : i32
    %c0_i32_0 = arith.constant 0 : i32
    %c0_i32_1 = arith.constant 0 : i32
    return %arg0, %c0_i32, %c0_i32_0 : i32, i32, i32
  }
  func.func @transform_2(%arg0: i32, %arg1: i32) -> (i32, i32, i32) {
    %c0_i32 = arith.constant 0 : i32
    %c0_i32_0 = arith.constant 0 : i32
    %c0_i32_1 = arith.constant 0 : i32
    return %arg0, %c0_i32, %c0_i32_0 : i32, i32, i32
  }
  func.func @transform_3(%arg0: i32, %arg1: i32) -> (i32, i32, i32) {
    %c0_i32 = arith.constant 0 : i32
    %c0_i32_0 = arith.constant 0 : i32
    %c0_i32_1 = arith.constant 0 : i32
    %c0_i32_2 = arith.constant 0 : i32
    return %c0_i32, %c0_i32_0, %c0_i32_1 : i32, i32, i32
  }
  func.func @transform_4(%arg0: i32, %arg1: i32) -> (i32, i32, i32) {
    %c0_i32 = arith.constant 0 : i32
    %c0_i32_0 = arith.constant 0 : i32
    %c0_i32_1 = arith.constant 0 : i32
    %c0_i32_2 = arith.constant 0 : i32
    return %c0_i32, %c0_i32_0, %c0_i32_1 : i32, i32, i32
  }
  func.func @transform_5(%arg0: i32, %arg1: i32) -> (i32, i32, i32) {
    %c0_i32 = arith.constant 0 : i32
    %c0_i32_0 = arith.constant 0 : i32
    %c0_i32_1 = arith.constant 0 : i32
    %c0_i32_2 = arith.constant 0 : i32
    return %c0_i32, %c0_i32_0, %c0_i32_1 : i32, i32, i32
  }
  func.func @transform_6(%arg0: i32, %arg1: i32) -> (i32, i32, i32) {
    %c0_i32 = arith.constant 0 : i32
    %c0_i32_0 = arith.constant 0 : i32
    %c0_i32_1 = arith.constant 0 : i32
    %c0_i32_2 = arith.constant 0 : i32
    return %c0_i32, %c0_i32_0, %c0_i32_1 : i32, i32, i32
  }
  func.func @transform_7(%arg0: i32, %arg1: i32) -> (i32, i32, i32) {
    %c0_i32 = arith.constant 0 : i32
    %c0_i32_0 = arith.constant 0 : i32
    %c0_i32_1 = arith.constant 0 : i32
    %c0_i32_2 = arith.constant 0 : i32
    return %c0_i32, %c0_i32_0, %c0_i32_1 : i32, i32, i32
  }
  func.func @transform_8(%arg0: i32, %arg1: i32) -> (i32, i32, i32) {
    %c0_i32 = arith.constant 0 : i32
    %c0_i32_0 = arith.constant 0 : i32
    %c0_i32_1 = arith.constant 0 : i32
    %c0_i32_2 = arith.constant 0 : i32
    return %c0_i32, %c0_i32_0, %c0_i32_1 : i32, i32, i32
  }
  func.func @transform_9(%arg0: i32, %arg1: i32) -> (i32, i32, i32) {
    %c0_i32 = arith.constant 0 : i32
    %c0_i32_0 = arith.constant 0 : i32
    %c0_i32_1 = arith.constant 0 : i32
    %c0_i32_2 = arith.constant 0 : i32
    return %c0_i32, %c0_i32_0, %c0_i32_1 : i32, i32, i32
  }
  func.func @transform_10(%arg0: i32, %arg1: i32) -> (i32, i32) {
    %c0_i32 = arith.constant 0 : i32
    %c0_i32_0 = arith.constant 0 : i32
    %c0_i32_1 = arith.constant 0 : i32
    return %c0_i32, %c0_i32_0 : i32, i32
  }
  func.func @transform_11(%arg0: i32, %arg1: i32) -> (i32, i32) {
    %c0_i32 = arith.constant 0 : i32
    %c0_i32_0 = arith.constant 0 : i32
    %c0_i32_1 = arith.constant 0 : i32
    return %c0_i32, %c0_i32_0 : i32, i32
  }
  func.func @transform_12(%arg0: i32, %arg1: i32) -> (i32, i32) {
    %c0_i32 = arith.constant 0 : i32
    %c0_i32_0 = arith.constant 0 : i32
    %c0_i32_1 = arith.constant 0 : i32
    return %c0_i32, %c0_i32_0 : i32, i32
  }
  func.func @transform_13(%arg0: i32, %arg1: i32) -> (i32, i32) {
    %c0_i32 = arith.constant 0 : i32
    %c0_i32_0 = arith.constant 0 : i32
    %c0_i32_1 = arith.constant 0 : i32
    return %c0_i32, %c0_i32_0 : i32, i32
  }
  func.func @transform_14(%arg0: i32, %arg1: i32) -> (i32, i32) {
    %c0_i32 = arith.constant 0 : i32
    %c0_i32_0 = arith.constant 0 : i32
    %c0_i32_1 = arith.constant 0 : i32
    return %c0_i32, %c0_i32_0 : i32, i32
  }
  func.func @transform_15(%arg0: i32, %arg1: i32) -> (i32, i32) {
    %c0_i32 = arith.constant 0 : i32
    %c0_i32_0 = arith.constant 0 : i32
    %c0_i32_1 = arith.constant 0 : i32
    return %c0_i32, %c0_i32_0 : i32, i32
  }
  func.func @transform_16(%arg0: i32, %arg1: i32) -> (i32, i32) {
    %c0_i32 = arith.constant 0 : i32
    %c0_i32_0 = arith.constant 0 : i32
    %c0_i32_1 = arith.constant 0 : i32
    return %c0_i32, %c0_i32_0 : i32, i32
  }
  func.func @transform_17(%arg0: i32, %arg1: i32) -> (i32, i32) {
    %c0_i32 = arith.constant 0 : i32
    %c0_i32_0 = arith.constant 0 : i32
    %c0_i32_1 = arith.constant 0 : i32
    return %c0_i32, %c0_i32_0 : i32, i32
  }
  func.func @transform_18(%arg0: i32, %arg1: i32) -> (i32, i32) {
    %c0_i32 = arith.constant 0 : i32
    %c0_i32_0 = arith.constant 0 : i32
    %c0_i32_1 = arith.constant 0 : i32
    return %c0_i32, %c0_i32_0 : i32, i32
  }
  func.func @transform_19(%arg0: i32, %arg1: i32) -> (i32, i32, i32) {
    %c0_i32 = arith.constant 0 : i32
    %c0_i32_0 = arith.constant 0 : i32
    return %arg0, %arg1, %c0_i32 : i32, i32, i32
  }
}

</mosaic_0001>

<bundles_post_ra>
// kernel: tpu_custom_call.1
= control target key start
LH: loop header
LB: loop body
LE: loop exit
PB: predicated region body
PF: predicated region fallthrough
CT: control target
= control target key end

     0   :  { %s5826_s0 = inlined_call_operand.hbm [shape: f32[2,8,32], index: 0, kind: input, shape index: {}]   ;;  %s5827_s1 = inlined_call_operand.hbm [shape: f32[2,8,32], index: 1, kind: input, shape index: {}]   ;;  %s5828_s2 = inlined_call_operand.hbm [shape: f32[2,1,8], index: 2, kind: input, shape index: {}]   ;;  %s5829_s3 = inlined_call_operand.hbm [shape: f32[4,32,8], index: 3, kind: input, shape index: {}]   ;;  %s5830_s4 = inlined_call_operand.hbm [shape: f32[4,1,8], index: 4, kind: input, shape index: {}]   ;;  %s5831_s5 = inlined_call_operand.hbm [shape: f32[4,32,8], index: 5, kind: input, shape index: {}]   ;;  %s5832_s6 = inlined_call_operand.hbm [shape: f32[4,1,8], index: 6, kind: input, shape index: {}]   ;;  %s5833_s7 = inlined_call_operand.hbm [shape: f32[4,32,8], index: 7, kind: input, shape index: {}]   ;;  %s5834_s8 = inlined_call_operand.hbm [shape: f32[4,1,8], index: 8, kind: input, shape index: {}]   ;;  %s5835_s9 = inlined_call_operand.hbm [shape: f32[4,8,32], index: 9, kind: input, shape index: {}]   ;;  %s5836_s10 = inlined_call_operand.hbm [shape: f32[1,32], index: 10, kind: input, shape index: {}]   ;;  %s5837_s11 = inlined_call_operand.hbm [shape: f32[1,32], index: 11, kind: input, shape index: {}]   ;;  %s5838_s12 = inlined_call_operand.hbm [shape: f32[1,32], index: 12, kind: input, shape index: {}]   ;;  %s5839_s13 = inlined_call_operand.hbm [shape: f32[32,64], index: 13, kind: input, shape index: {}]   ;;  %s5840_s14 = inlined_call_operand.hbm [shape: f32[1,64], index: 14, kind: input, shape index: {}]   ;;  %s5841_s15 = inlined_call_operand.hbm [shape: f32[64,32], index: 15, kind: input, shape index: {}]   ;;  %s5842_s16 = inlined_call_operand.hbm [shape: f32[1,32], index: 16, kind: input, shape index: {}]   ;;  %s5843_s17 = inlined_call_operand.hbm [shape: f32[1,32], index: 17, kind: input, shape index: {}]   ;;  %s5844_s18 = inlined_call_operand.hbm [shape: f32[1,32], index: 18, kind: input, shape index: {}]   ;;  %s5845_s19 = inlined_call_operand.hbm [shape: f32[2,8,32], index: 19, kind: output, shape index: {}]  }
   0x1   :  { %5882 = sst [smem:[#allocation51_spill]] %s5826_s0 }
   0x2   :  { %5883 = sst [smem:[#allocation52_spill]] %s5827_s1 }
   0x3   :  { %5884 = sst [smem:[#allocation53_spill]] %s5828_s2 }
   0x4   :  { %5885 = sst [smem:[#allocation54_spill]] %s5829_s3 }
   0x5   :  { %5886 = sst [smem:[#allocation55_spill]] %s5830_s4 }
   0x6   :  { %5887 = sst [smem:[#allocation56_spill]] %s5831_s5 }
   0x7   :  { %5888 = sst [smem:[#allocation57_spill]] %s5832_s6 }
   0x8   :  { %5889 = sst [smem:[#allocation58_spill]] %s5833_s7 }
   0x9   :  { %5890 = sst [smem:[#allocation59_spill]] %s5834_s8 }
   0xa   :  { %5891 = sst [smem:[#allocation60_spill]] %s5835_s9 }
   0xb   :  { %5892 = sst [smem:[#allocation61_spill]] %s5836_s10 }
   0xc   :  { %5893 = sst [smem:[#allocation62_spill]] %s5837_s11 }
   0xd   :  { %5894 = sst [smem:[#allocation63_spill]] %s5838_s12 }
   0xe   :  { %5895 = sst [smem:[#allocation64_spill]] %s5839_s13 }
   0xf   :  { %5896 = sst [smem:[#allocation65_spill]] %s5840_s14 }
  0x10   :  { %5897 = sst [smem:[#allocation66_spill]] %s5841_s15 }
  0x11   :  { %5898 = sst [smem:[#allocation67_spill]] %s5842_s16 }
  0x12   :  { %5899 = sst [smem:[#allocation68_spill]] %s5843_s17 }
  0x13   :  { %5900 = sst [smem:[#allocation69_spill]] %s5844_s18 }
  0x14   :  { %5901 = sst [smem:[#allocation70_spill]] %s5845_s19 }
  0x15   :  { %24 = vsyncpa [#allocation5], 0 }
  0x16   :  { %26 = vsyncpa [#allocation5 + $0x1], 0 }
  0x17   :  { %27 = vsyncpa [#allocation8], 0 }
  0x18   :  { %29 = vsyncpa [#allocation8 + $0x1], 0 }
  0x19   :  { %30 = vsyncpa [#allocation11], 0 }
  0x1a   :  { %31 = vsyncpa [#allocation14], 0 }
  0x1b   :  { %32 = vsyncpa [#allocation17], 0 }
  0x1c   :  { %33 = vsyncpa [#allocation20], 0 }
  0x1d   :  { %34 = vsyncpa [#allocation23], 0 }
  0x1e   :  { %35 = vsyncpa [#allocation26], 0 }
  0x1f   :  { %36 = vsyncpa [#allocation29], 0 }
  0x20   :  { %37 = vsyncpa [#allocation32], 0 }
  0x21   :  { %38 = vsyncpa [#allocation6], 0 }
  0x22   :  { %40 = vsyncpa [#allocation6 + $0x1], 0  ;;  %s4988_s0 = smov 0   ;;  %s4990_s30 = smov 0  }
  0x23   :  { %s4992_s20 = smov 0   ;;  %s4994_s21 = smov 0  }
  0x24   :  { %s4996_s1 = smov 0   ;;  %s4998_s22 = smov 0  }
  0x25 LB: > { %5902 = sst [smem:[#allocation46_spill]] %s4847_s20  ;;  %s5019_s2 = sadd.s32 4294967295, %s4859_s22   ;;  %s4859_s22 = sphi %s4998_s22, %s46_s22   ;;  %s4855_s1 = sphi %s4996_s1, %s5974_s1   ;;  %s4851_s21 = sphi %s4994_s21, %s5973_s21   ;;  %s4847_s20 = sphi %s4992_s20, %s5969_s20   ;;  %s4843_s30 = sphi %s4990_s30, %s5972_s30   ;;  %s4839_s0 = sphi %s4988_s0, %s5971_s0  }
  0x26   : > { %5903 = sst [smem:[#allocation47_spill]] %s4851_s21  ;;  %p3436_p0 = scmp.ge.s32.totalorder %s4859_s22, 1 }
  0x27   : > { %p5859_p1 = scmp.eq.s32.totalorder %s5019_s2, 0  ;;  %p507_p2 = scmp.lt.s32.totalorder %s4859_s22, 3 }
  0x28   : > { %s4861_s24 = smov [#allocation10]   ;;  %s4862_s26 = smov [#allocation13]  }
  0x29   : > { %p5024_p3 = pnand %p3436_p0, %p507_p2  ;;  %s519_s25 = sshll.u32 %s4861_s24, 4  ;;  %s5028_s25 = int_to_ptr.vmem [resolvable:$true] %s519_s25 }
  0x2a   : > { %s545_s27 = sshll.u32 %s4862_s26, 4  ;;  %s4863_s28 = smov [#allocation16]   ;;  %s5039_s27 = int_to_ptr.vmem [resolvable:$true] %s545_s27 }
  0x2b   : > { %s5904_s23 = scalar_select %p5024_p3, 1, 0 }
  0x2c   : > { %p4015_p4 = pneg %p5024_p3  ;;  %s5041_s29 = sshll.u32 %s4863_s28, 4  ;;  %s572_s29 = int_to_ptr.vmem [resolvable:$true] %s5041_s29 }
  0x2d   : > { %5905 = sst [smem:[#allocation48_spill]] %s5904_s23  ;;  %s5907_s21 = sld [smem:[#allocation54_spill]] }
  0x2e   : > { %p5035_p6 = pnand %p4015_p4, %p5859_p1 }
  0x30   : > { %s5906_s3 = scalar_select %p5035_p6, 1, 0 }
  0x31   : > { %p5051_p8 = pneg %p5035_p6 }
  0x33   : > { %s5908_s18 = smov %s5907_s21  ;;  %s4203_s16 = scalar_lea.hbm %s5907_s21, 2048 }
  0x34   : > { %p4204_p7 = scmp.ne.s32.totalorder %s5908_s18, %s4203_s16  ;;  %p4210_p11 = scmp.lt.u32.totalorder %s4203_s16, %s5908_s18 }
  0x35   : > { %s5909_s12 = scalar_select %p5051_p8, 1, 0 }
  0x36   : > { %p4206_p9 = pnand %p5051_p8, %p4204_p7 }
  0x38   : > { %p4207_p10 = pneg %p4206_p9 }
  0x3a   : > { %p4212_p12 = pnand %p4210_p11, %p4207_p10 }
  0x3c   : > { %4215 = shalt.err (!%p4212_p12)
}
  0x3d   : > { %s4216_s14 = scalar_lea.vmem %s5028_s25, 2048  ;;  %p4224_p4 = scmp.lt.s32.totalorder %s5028_s25, %s5028_s25 }
  0x3e   : > { %p4217_p13 = scmp.ne.s32.totalorder %s5028_s25, %s4216_s14  ;;  %p4225_p5 = scmp.lt.s32.totalorder %s4216_s14, %s4216_s14 }
  0x40   : > { %p4219_p0 = pnand %p4217_p13, %p5051_p8  ;;  %p4226_p7 = por %p4225_p5, %p4224_p4 }
  0x42   : > { %p4220_p2 = pneg %p4219_p0 }
  0x44   : > { %p4227_p9 = pnand %p4226_p7, %p4220_p2 }
  0x46   : > { %4230 = shalt.err (!%p4227_p9)
}
  0x47   : > { %s4864_s19 = smov 128   ;;  %s4865_s16 = smov 8  }
  0x48   : > { %4018 = dma.hbm_to_vmem [thread:$0]  (!%p5035_p6), %s5908_s18, 2048, %s5028_s25, [#allocation11], %s4864_s19, %s4864_s19, %s4865_s16  }
  0x49   : > { %s5910_s5 = sld [smem:[#allocation56_spill]] }
  0x4f   : > { %s4231_s28 = scalar_lea.hbm %s5910_s5, 2048 }
  0x50   : > { %p4232_p5 = scmp.ne.s32.totalorder %s5910_s5, %s4231_s28  ;;  %p4238_p12 = scmp.lt.u32.totalorder %s4231_s28, %s5910_s5 }
  0x52   : > { %p4234_p10 = pnand %p4232_p5, %p5051_p8 }
  0x54   : > { %p4235_p11 = pneg %p4234_p10 }
  0x56   : > { %p4240_p13 = pnand %p4238_p12, %p4235_p11 }
  0x58   : > { %4243 = shalt.err (!%p4240_p13)
}
  0x59   : > { %s4244_s25 = scalar_lea.vmem %s5039_s27, 2048  ;;  %p4252_p7 = scmp.lt.s32.totalorder %s5039_s27, %s5039_s27 }
  0x5a   : > { %p4245_p0 = scmp.ne.s32.totalorder %s5039_s27, %s4244_s25  ;;  %p4253_p9 = scmp.lt.s32.totalorder %s4244_s25, %s4244_s25 }
  0x5c   : > { %p4247_p2 = pnand %p4245_p0, %p5051_p8  ;;  %p4254_p5 = por %p4253_p9, %p4252_p7 }
  0x5e   : > { %p4248_p4 = pneg %p4247_p2 }
  0x60   : > { %p4255_p10 = pnand %p4254_p5, %p4248_p4 }
  0x62   : > { %4258 = shalt.err (!%p4255_p10)
}
  0x63   : > { %4024 = dma.hbm_to_vmem [thread:$0]  (!%p5035_p6), %s5910_s5, 2048, %s5039_s27, [#allocation14], %s4864_s19, %s4864_s19, %s4865_s16  }
  0x64   : > { %s5911_s7 = sld [smem:[#allocation58_spill]] }
  0x6a   : > { %s4259_s23 = scalar_lea.hbm %s5911_s7, 2048 }
  0x6b   : > { %p4260_p11 = scmp.ne.s32.totalorder %s5911_s7, %s4259_s23  ;;  %p4266_p0 = scmp.lt.u32.totalorder %s4259_s23, %s5911_s7 }
  0x6d   : > { %p4262_p12 = pnand %p4260_p11, %p5051_p8 }
  0x6f   : > { %p4263_p13 = pneg %p4262_p12 }
  0x71   : > { %p4268_p2 = pnand %p4266_p0, %p4263_p13 }
  0x73   : > { %4271 = shalt.err (!%p4268_p2)
}
  0x74   : > { %s4272_s25 = scalar_lea.vmem %s572_s29, 2048  ;;  %p4280_p5 = scmp.lt.s32.totalorder %s572_s29, %s572_s29 }
  0x75   : > { %p4273_p4 = scmp.ne.s32.totalorder %s572_s29, %s4272_s25  ;;  %p4281_p10 = scmp.lt.s32.totalorder %s4272_s25, %s4272_s25 }
  0x77   : > { %p4275_p7 = pnand %p4273_p4, %p5051_p8  ;;  %p4282_p1 = por %p4281_p10, %p4280_p5 }
  0x79   : > { %p4276_p9 = pneg %p4275_p7 }
  0x7b   : > { %p4283_p3 = pnand %p4282_p1, %p4276_p9 }
  0x7d   : > { %4286 = shalt.err (!%p4283_p3)
}
  0x7e   : > { %4030 = dma.hbm_to_vmem [thread:$0]  (!%p5035_p6), %s5911_s7, 2048, %s572_s29, [#allocation17], %s4864_s19, %s4864_s19, %s4865_s16  }
  0x7f   : > { %s4866_s8 = smov [#allocation19]   ;;  %s4867_s21 = smov [#allocation22]  }
  0x80   : > { %s597_s10 = sshll.u32 %s4866_s8, 4  ;;  %s622_s23 = sshll.u32 %s4867_s21, 4  ;;  %s598_s10 = int_to_ptr.vmem [resolvable:$true] %s597_s10  ;;  %s623_s23 = int_to_ptr.vmem [resolvable:$true] %s622_s23 }
  0x81   : > { %s5912_s9 = sld [smem:[#allocation60_spill]] }
  0x87   : > { %s4287_s28 = scalar_lea.hbm %s5912_s9, 512 }
  0x88   : > { %p4288_p1 = scmp.ne.s32.totalorder %s5912_s9, %s4287_s28  ;;  %p4294_p12 = scmp.lt.u32.totalorder %s4287_s28, %s5912_s9 }
  0x8a   : > { %p4290_p3 = pnand %p4288_p1, %p5051_p8 }
  0x8c   : > { %p4291_p11 = pneg %p4290_p3 }
  0x8e   : > { %p4296_p13 = pnand %p4294_p12, %p4291_p11 }
  0x90   : > { %4299 = shalt.err (!%p4296_p13)
}
  0x91   : > { %s4300_s29 = scalar_lea.vmem %s598_s10, 512  ;;  %p4308_p7 = scmp.lt.s32.totalorder %s598_s10, %s598_s10 }
  0x92   : > { %p4301_p0 = scmp.ne.s32.totalorder %s598_s10, %s4300_s29  ;;  %p4309_p9 = scmp.lt.s32.totalorder %s4300_s29, %s4300_s29 }
  0x94   : > { %p4303_p2 = pnand %p4301_p0, %p5051_p8  ;;  %p4310_p5 = por %p4309_p9, %p4308_p7 }
  0x96   : > { %p4304_p4 = pneg %p4303_p2 }
  0x98   : > { %p4311_p10 = pnand %p4310_p5, %p4304_p4 }
  0x9a   : > { %4314 = shalt.err (!%p4311_p10)
}
  0x9b   : > { %4036 = dma.hbm_to_vmem [thread:$0]  (!%p5035_p6), %s5912_s9, 512, %s598_s10, [#allocation20], %s4864_s19, %s4864_s19, %s4865_s16  }
  0x9c   : > { %s5913_s11 = sld [smem:[#allocation62_spill]] }
  0xa2   : > { %s4315_s24 = scalar_lea.hbm %s5913_s11, 16 }
  0xa3   : > { %p4316_p1 = scmp.ne.s32.totalorder %s5913_s11, %s4315_s24  ;;  %p4322_p12 = scmp.lt.u32.totalorder %s4315_s24, %s5913_s11 }
  0xa5   : > { %p4318_p3 = pnand %p4316_p1, %p5051_p8 }
  0xa7   : > { %p4319_p11 = pneg %p4318_p3 }
  0xa9   : > { %p4324_p13 = pnand %p4322_p12, %p4319_p11 }
  0xab   : > { %4327 = shalt.err (!%p4324_p13)
}
  0xac   : > { %s4328_s27 = scalar_lea.vmem %s623_s23, 16  ;;  %s4335_s10 = scalar_lea.vmem %s623_s23, 32 }
  0xad   : > { %p4329_p0 = scmp.ne.s32.totalorder %s623_s23, %s4328_s27  ;;  %p4336_p7 = scmp.lt.s32.totalorder %s623_s23, %s623_s23 }
  0xae   : > { %p4337_p9 = scmp.lt.s32.totalorder %s4335_s10, %s4328_s27 }
  0xaf   : > { %p4331_p2 = pnand %p4329_p0, %p5051_p8 }
  0xb0   : > { %p4338_p5 = por %p4337_p9, %p4336_p7 }
  0xb1   : > { %p4332_p4 = pneg %p4331_p2 }
  0xb3   : > { %p4339_p10 = pnand %p4338_p5, %p4332_p4 }
  0xb5   : > { %4342 = shalt.err (!%p4339_p10)
}
  0xb6   : > { %4042 = dma.hbm_to_vmem [thread:$0]  (!%p5035_p6), %s5913_s11, 16, %s623_s23, [#allocation23]  }
  0xb7   : > { %s4868_s6 = smov [#allocation25]   ;;  %s4869_s21 = smov [#allocation28]  }
  0xb8   : > { %s643_s8 = sshll.u32 %s4868_s6, 4  ;;  %s667_s24 = sshll.u32 %s4869_s21, 4  ;;  %s644_s8 = int_to_ptr.vmem [resolvable:$true] %s643_s8  ;;  %s668_s24 = int_to_ptr.vmem [resolvable:$true] %s667_s24 }
  0xb9   : > { %s5914_s13 = sld [smem:[#allocation64_spill]] }
  0xbf   : > { %s4343_s14 = scalar_lea.hbm %s5914_s13, 512 }
  0xc0   : > { %p4344_p1 = scmp.ne.s32.totalorder %s5914_s13, %s4343_s14  ;;  %p4350_p12 = scmp.lt.u32.totalorder %s4343_s14, %s5914_s13 }
  0xc2   : > { %p4346_p3 = pnand %p4344_p1, %p5051_p8 }
  0xc4   : > { %p4347_p11 = pneg %p4346_p3 }
  0xc6   : > { %p4352_p13 = pnand %p4350_p12, %p4347_p11 }
  0xc8   : > { %4355 = shalt.err (!%p4352_p13)
}
  0xc9   : > { %s4356_s23 = scalar_lea.vmem %s644_s8, 512  ;;  %p4364_p7 = scmp.lt.s32.totalorder %s644_s8, %s644_s8 }
  0xca   : > { %p4357_p0 = scmp.ne.s32.totalorder %s644_s8, %s4356_s23  ;;  %p4365_p9 = scmp.lt.s32.totalorder %s4356_s23, %s4356_s23 }
  0xcc   : > { %p4359_p2 = pnand %p4357_p0, %p5051_p8  ;;  %p4366_p5 = por %p4365_p9, %p4364_p7 }
  0xce   : > { %p4360_p4 = pneg %p4359_p2 }
  0xd0   : > { %p4367_p10 = pnand %p4366_p5, %p4360_p4 }
  0xd2   : > { %4370 = shalt.err (!%p4367_p10)
}
  0xd3   : > { %4048 = dma.hbm_to_vmem [thread:$0]  (!%p5035_p6), %s5914_s13, 512, %s644_s8, [#allocation26], %s4864_s19, %s4864_s19, %s4865_s16  }
  0xd4   : > { %s5915_s15 = sld [smem:[#allocation66_spill]] }
  0xda   : > { %s4371_s28 = scalar_lea.hbm %s5915_s15, 1024 }
  0xdb   : > { %p4372_p1 = scmp.ne.s32.totalorder %s5915_s15, %s4371_s28  ;;  %p4378_p12 = scmp.lt.u32.totalorder %s4371_s28, %s5915_s15 }
  0xdd   : > { %p4374_p3 = pnand %p4372_p1, %p5051_p8 }
  0xdf   : > { %p4375_p11 = pneg %p4374_p3 }
  0xe1   : > { %p4380_p13 = pnand %p4378_p12, %p4375_p11 }
  0xe3   : > { %4383 = shalt.err (!%p4380_p13)
}
  0xe4   : > { %s4384_s29 = scalar_lea.vmem %s668_s24, 1024  ;;  %p4392_p7 = scmp.lt.s32.totalorder %s668_s24, %s668_s24 }
  0xe5   : > { %p4385_p0 = scmp.ne.s32.totalorder %s668_s24, %s4384_s29  ;;  %p4393_p9 = scmp.lt.s32.totalorder %s4384_s29, %s4384_s29 }
  0xe7   : > { %p4387_p2 = pnand %p4385_p0, %p5051_p8  ;;  %p4394_p5 = por %p4393_p9, %p4392_p7 }
  0xe9   : > { %p4388_p4 = pneg %p4387_p2 }
  0xeb   : > { %p4395_p10 = pnand %p4394_p5, %p4388_p4 }
  0xed   : > { %4398 = shalt.err (!%p4395_p10)
}
  0xee   : > { %4054 = dma.hbm_to_vmem [thread:$0]  (!%p5035_p6), %s5915_s15, 1024, %s668_s24, [#allocation29], %s4864_s19, %s4864_s19, %s4865_s16  }
  0xef   : > { %s4870_s5 = smov [#allocation31]   ;;  %s5916_s17 = sld [smem:[#allocation68_spill]] }
  0xf0   : > { %s692_s6 = sshll.u32 %s4870_s5, 4  ;;  %s693_s6 = int_to_ptr.vmem [resolvable:$true] %s692_s6 }
  0xf5   : > { %s4399_s28 = scalar_lea.hbm %s5916_s17, 16 }
  0xf6   : > { %p4400_p1 = scmp.ne.s32.totalorder %s5916_s17, %s4399_s28  ;;  %p4406_p12 = scmp.lt.u32.totalorder %s4399_s28, %s5916_s17 }
  0xf8   : > { %p4402_p3 = pnand %p4400_p1, %p5051_p8 }
  0xfa   : > { %p4403_p11 = pneg %p4402_p3 }
  0xfc   : > { %p4408_p13 = pnand %p4406_p12, %p4403_p11 }
  0xfe   : > { %4411 = shalt.err (!%p4408_p13)
}
  0xff   : > { %s4412_s19 = scalar_lea.vmem %s693_s6, 16  ;;  %s4419_s16 = scalar_lea.vmem %s693_s6, 32 }
 0x100   : > { %p4413_p0 = scmp.ne.s32.totalorder %s693_s6, %s4412_s19  ;;  %p4420_p7 = scmp.lt.s32.totalorder %s693_s6, %s693_s6 }
 0x101   : > { %p4421_p9 = scmp.lt.s32.totalorder %s4419_s16, %s4412_s19 }
 0x102   : > { %p4415_p2 = pnand %p4413_p0, %p5051_p8 }
 0x103   : > { %p4422_p5 = por %p4421_p9, %p4420_p7 }
 0x104   : > { %p4416_p4 = pneg %p4415_p2 }
 0x106   : > { %p4423_p10 = pnand %p4422_p5, %p4416_p4 }
 0x108   : > { %4426 = shalt.err (!%p4423_p10)
}
 0x109   : > { %4060 = dma.hbm_to_vmem [thread:$0]  (!%p5035_p6), %s5916_s17, 16, %s693_s6, [#allocation32]  }
 0x10a   : > { %s3435_s8 = sadd.s32 4294967294, %s4859_s22   ;;  %s58_s23 = sadd.s32 1, %s4855_s1 }
 0x10b   : > { %p60_p1 = scmp.ge.s32.totalorder %s58_s23, 2  ;;  %s67_s5 = sadd.s32 1, %s4847_s20 }
 0x10c   : > { %p74_p3 = scmp.ne.s32.totalorder %s4847_s20, %s4843_s30  ;;  %p75_p11 = scmp.eq.s32.totalorder %s4859_s22, 0 }
 0x10d   : > { %s5976_s23 = smov (%p60_p1, %s58_s23), 0  ;;  %p80_p13 = scmp.ne.s32.totalorder %s4843_s30, %s4839_s0 }
 0x10e   : > { %5917 = sst [smem:[#allocation49_spill]] %s5976_s23  ;;  %p5230_p12 = por %p75_p11, %p74_p3 }
 0x10f   : > { %s62_s6 = ssub.s32 %s4855_s1, %s5976_s23  ;;  %p494_p0 = scmp.eq.s32.totalorder %s5019_s2, 1 }
 0x110   : > { %p65_p2 = scmp.eq.s32.totalorder %s62_s6, 0  ;;  %p5919_p4 = scmp.eq.s32.totalorder %s5019_s2, 0 }
 0x111   : > { %p5245_p9 = por %p494_p0, %p74_p3  ;;  %p500_p5 = scmp.eq.s32.totalorder %s3435_s8, 1 }
 0x112   : > { %p5241_p7 = por %p5919_p4, %p80_p13  ;;  %p4094_p1 = scmp.lt.s32.totalorder %s4859_s22, 2 }
 0x113   : > { %s5921_s28 = scalar_select %p5245_p9, 1, 0 }
 0x114   : > { %s5920_s26 = scalar_select %p5241_p7, 1, 0 }
 0x115   : > { %s5250_s14 = scalar_select %p65_p2, %s4847_s20, %s67_s5  }
 0x116   : > { %p5252_p10 = por %p500_p5, %p80_p13  ;;  %s5258_s27 = sand.u32 1, %s4847_s20  }
 0x117   : > { %5922 = sst [smem:[#allocation50_spill]] %s5250_s14  ;;  %s5862_s10 = sshll.u32 %s4855_s1, 7 }
 0x118   : > { %s5923_s25 = scalar_select %p5252_p10, 1, 0 }
 0x119   : > { %s5861_s19 = sshll.u32 %s5258_s27, 3  ;;  %p5264_p11 = pnand %p4094_p1, %p5230_p12 }
 0x11a   : > { %s733_s24 = sand.u32 1, %s4859_s22   ;;  %s5925_s5 = sld [smem:[#allocation52_spill]] }
 0x11b   : > { %s5924_s16 = scalar_select %p5264_p11, 1, 0 }
 0x11c   : > { %s737_s7 = scalar_lea.vmem [#allocation7], %s5861_s19  ;;  %s5280_s21 = scalar_lea.sflag [#allocation8], %s733_s24 }
 0x11d   : > { %s744_s9 = sshll.u32 %s737_s7, 4  ;;  %p5286_p12 = pneg %p5264_p11  ;;  %s5278_s9 = int_to_ptr.vmem [resolvable:$true] %s744_s9 }
 0x11f   : > { %s5926_s13 = scalar_select %p5286_p12, 1, 0 }
 0x120   : > { %s5274_s6 = scalar_lea.hbm %s5925_s5, %s5862_s10  ;;  %s4432_s19 = scalar_lea.hbm %s5925_s5, 256 }
 0x121   : > { %s4427_s11 = scalar_lea.hbm %s5274_s6, 128  ;;  %p4433_p2 = scmp.lt.u32.totalorder %s5274_s6, %s5925_s5 }
 0x122   : > { %p4428_p3 = scmp.ne.s32.totalorder %s5274_s6, %s4427_s11  ;;  %p4434_p4 = scmp.lt.u32.totalorder %s4432_s19, %s4427_s11 }
 0x123   : > { %p4436_p1 = scmp.lt.u32.totalorder %s4427_s11, %s5274_s6 }
 0x124   : > { %p4430_p13 = pnand %p5286_p12, %p4428_p3  ;;  %p4435_p5 = por %p4434_p4, %p4433_p2 }
 0x126   : > { %p4431_p0 = pneg %p4430_p13  ;;  %p4437_p10 = por %p4436_p1, %p4435_p5 }
 0x128   : > { %p4438_p9 = pnand %p4437_p10, %p4431_p0 }
 0x12a   : > { %4441 = shalt.err (!%p4438_p9)
}
 0x12b   : > { %s4442_s24 = scalar_lea.vmem %s5278_s9, 128  ;;  %s4871_s29 = smov [#allocation7]  }
 0x12c   : > { %p4443_p3 = scmp.ne.s32.totalorder %s5278_s9, %s4442_s24  ;;  %s4447_s8 = sshll.u32 %s4871_s29, 4  ;;  %s4448_s8 = int_to_ptr.vmem [resolvable:$false] %s4447_s8 }
 0x12d   : > { %s4449_s10 = scalar_lea.vmem %s4448_s8, 256  ;;  %p4450_p6 = scmp.lt.s32.totalorder %s5278_s9, %s4448_s8 }
 0x12e   : > { %p4445_p13 = pnand %p4443_p3, %p5286_p12  ;;  %p4451_p8 = scmp.lt.s32.totalorder %s4449_s10, %s4442_s24 }
 0x130   : > { %p4446_p7 = pneg %p4445_p13  ;;  %p4452_p2 = por %p4451_p8, %p4450_p6 }
 0x132   : > { %p4453_p4 = pnand %p4452_p2, %p4446_p7 }
 0x134   : > { %4456 = shalt.err (!%p4453_p4)
}
 0x135   : > { %4070 = dma.hbm_to_vmem [thread:$0]  (!%p5264_p11), %s5274_s6, 128, %s5278_s9, %s5280_s21  }
 0x136   : > { %s4872_s11 = smov [#allocation12]   ;;  %s5927_s4 = sld [smem:[#allocation55_spill]] }
 0x137   : > { %s532_s19 = sshll.u32 %s4872_s11, 4  ;;  %p5928_p8 = scmp.ne.s32.totalorder %s5909_s12, 0  ;;  %s533_s19 = int_to_ptr.vmem [resolvable:$true] %s532_s19 }
 0x13c   : > { %s4457_s29 = scalar_lea.hbm %s5927_s4, 64 }
 0x13d   : > { %p4458_p6 = scmp.ne.s32.totalorder %s5927_s4, %s4457_s29  ;;  %p4464_p10 = scmp.lt.u32.totalorder %s4457_s29, %s5927_s4 }
 0x13f   : > { %p4460_p7 = pnand %p4458_p6, %p5928_p8 }
 0x141   : > { %p4461_p9 = pneg %p4460_p7 }
 0x143   : > { %p4466_p0 = pnand %p4464_p10, %p4461_p9 }
 0x145   : > { %4469 = shalt.err (!%p4466_p0)
}
 0x146   : > { %s4470_s9 = scalar_lea.vmem %s533_s19, 64  ;;  %p4478_p13 = scmp.lt.s32.totalorder %s533_s19, %s533_s19 }
 0x147   : > { %p4471_p5 = scmp.ne.s32.totalorder %s533_s19, %s4470_s9  ;;  %p4479_p2 = scmp.lt.s32.totalorder %s4470_s9, %s4470_s9 }
 0x149   : > { %p4473_p1 = pnand %p4471_p5, %p5928_p8  ;;  %p4480_p4 = por %p4479_p2, %p4478_p13 }
 0x14b   : > { %p4474_p3 = pneg %p4473_p1 }
 0x14d   : > { %p4481_p11 = pnand %p4480_p4, %p4474_p3 }
 0x14f   : > { %4484 = shalt.err (!%p4481_p11)
}
 0x150   : > { %s4873_s15 = smov 16   ;;  %s4874_s5 = smov 1  }
 0x151   : > { %p5929_p6 = scmp.ne.s32.totalorder %s5906_s3, 0  ;;  %s4875_s7 = smov [#allocation15]  }
 0x152   : > { %s558_s29 = sshll.u32 %s4875_s7, 4  ;;  %s4876_s8 = smov [#allocation18]   ;;  %s559_s29 = int_to_ptr.vmem [resolvable:$true] %s558_s29 }
 0x153   : > { %4021 = dma.hbm_to_vmem [thread:$0]  (!%p5929_p6), %s5927_s4, 64, %s533_s19, [#allocation11], %s4873_s15, %s4873_s15, %s4874_s5  }
 0x154   : > { %s584_s24 = sshll.u32 %s4876_s8, 4  ;;  %s5930_s17 = sld [smem:[#allocation57_spill]]  ;;  %s5331_s24 = int_to_ptr.vmem [resolvable:$true] %s584_s24 }
 0x15a   : > { %s4485_s18 = scalar_lea.hbm %s5930_s17, 64 }
 0x15b   : > { %p4486_p11 = scmp.ne.s32.totalorder %s5930_s17, %s4485_s18  ;;  %p4492_p10 = scmp.lt.u32.totalorder %s4485_s18, %s5930_s17 }
 0x15d   : > { %p4488_p7 = pnand %p4486_p11, %p5928_p8 }
 0x15f   : > { %p4489_p9 = pneg %p4488_p7 }
 0x161   : > { %p4494_p0 = pnand %p4492_p10, %p4489_p9 }
 0x163   : > { %4497 = shalt.err (!%p4494_p0)
}
 0x164   : > { %s4498_s11 = scalar_lea.vmem %s559_s29, 64  ;;  %p4506_p13 = scmp.lt.s32.totalorder %s559_s29, %s559_s29 }
 0x165   : > { %p4499_p5 = scmp.ne.s32.totalorder %s559_s29, %s4498_s11  ;;  %p4507_p2 = scmp.lt.s32.totalorder %s4498_s11, %s4498_s11 }
 0x167   : > { %p4501_p1 = pnand %p4499_p5, %p5928_p8  ;;  %p4508_p4 = por %p4507_p2, %p4506_p13 }
 0x169   : > { %p4502_p3 = pneg %p4501_p1 }
 0x16b   : > { %p4509_p12 = pnand %p4508_p4, %p4502_p3 }
 0x16d   : > { %4512 = shalt.err (!%p4509_p12)
}
 0x16e   : > { %4027 = dma.hbm_to_vmem [thread:$0]  (!%p5929_p6), %s5930_s17, 64, %s559_s29, [#allocation14], %s4873_s15, %s4873_s15, %s4874_s5  }
 0x16f   : > { %s5931_s8 = sld [smem:[#allocation59_spill]] }
 0x175   : > { %s4513_s10 = scalar_lea.hbm %s5931_s8, 64 }
 0x176   : > { %p4514_p11 = scmp.ne.s32.totalorder %s5931_s8, %s4513_s10  ;;  %p4520_p9 = scmp.lt.u32.totalorder %s4513_s10, %s5931_s8 }
 0x178   : > { %p4516_p12 = pnand %p4514_p11, %p5928_p8 }
 0x17a   : > { %p4517_p7 = pneg %p4516_p12 }
 0x17c   : > { %p4522_p10 = pnand %p4520_p9, %p4517_p7 }
 0x17e   : > { %4525 = shalt.err (!%p4522_p10)
}
 0x17f   : > { %s4526_s29 = scalar_lea.vmem %s5331_s24, 64  ;;  %p4534_p3 = scmp.lt.s32.totalorder %s5331_s24, %s5331_s24 }
 0x180   : > { %p4527_p0 = scmp.ne.s32.totalorder %s5331_s24, %s4526_s29  ;;  %p4535_p13 = scmp.lt.s32.totalorder %s4526_s29, %s4526_s29 }
 0x182   : > { %p4529_p5 = pnand %p4527_p0, %p5928_p8  ;;  %p4536_p2 = por %p4535_p13, %p4534_p3 }
 0x184   : > { %p4530_p1 = pneg %p4529_p5 }
 0x186   : > { %p4537_p4 = pnand %p4536_p2, %p4530_p1 }
 0x188   : > { %4540 = shalt.err (!%p4537_p4)
}
 0x189   : > { %4033 = dma.hbm_to_vmem [thread:$0]  (!%p5929_p6), %s5931_s8, 64, %s5331_s24, [#allocation17], %s4873_s15, %s4873_s15, %s4874_s5  }
 0x18a   : > { %s4877_s14 = smov [#allocation21]   ;;  %s4878_s10 = smov [#allocation24]  }
 0x18b   : > { %s611_s7 = sshll.u32 %s4877_s14, 4  ;;  %s633_s9 = sshll.u32 %s4878_s10, 4  ;;  %s612_s7 = int_to_ptr.vmem [resolvable:$true] %s611_s7  ;;  %s5380_s9 = int_to_ptr.vmem [resolvable:$true] %s633_s9 }
 0x18c   : > { %s5932_s11 = sld [smem:[#allocation61_spill]] }
 0x192   : > { %s4541_s29 = scalar_lea.hbm %s5932_s11, 16 }
 0x193   : > { %p4542_p11 = scmp.ne.s32.totalorder %s5932_s11, %s4541_s29  ;;  %p4548_p9 = scmp.lt.u32.totalorder %s4541_s29, %s5932_s11 }
 0x195   : > { %p4544_p12 = pnand %p4542_p11, %p5928_p8 }
 0x197   : > { %p4545_p7 = pneg %p4544_p12 }
 0x199   : > { %p4550_p10 = pnand %p4548_p9, %p4545_p7 }
 0x19b   : > { %4553 = shalt.err (!%p4550_p10)
}
 0x19c   : > { %s4554_s5 = scalar_lea.vmem %s612_s7, 16  ;;  %s4561_s24 = scalar_lea.vmem %s612_s7, 32 }
 0x19d   : > { %p4555_p0 = scmp.ne.s32.totalorder %s612_s7, %s4554_s5  ;;  %p4562_p3 = scmp.lt.s32.totalorder %s612_s7, %s612_s7 }
 0x19e   : > { %p4563_p13 = scmp.lt.s32.totalorder %s4561_s24, %s4554_s5 }
 0x19f   : > { %p4557_p5 = pnand %p4555_p0, %p5928_p8 }
 0x1a0   : > { %p4564_p2 = por %p4563_p13, %p4562_p3 }
 0x1a1   : > { %p4558_p1 = pneg %p4557_p5 }
 0x1a3   : > { %p4565_p4 = pnand %p4564_p2, %p4558_p1 }
 0x1a5   : > { %4568 = shalt.err (!%p4565_p4)
}
 0x1a6   : > { %4039 = dma.hbm_to_vmem [thread:$0]  (!%p5929_p6), %s5932_s11, 16, %s612_s7, [#allocation20]  }
 0x1a7   : > { %s5933_s10 = sld [smem:[#allocation63_spill]] }
 0x1ad   : > { %s4569_s6 = scalar_lea.hbm %s5933_s10, 16 }
 0x1ae   : > { %p4570_p11 = scmp.ne.s32.totalorder %s5933_s10, %s4569_s6  ;;  %p4576_p9 = scmp.lt.u32.totalorder %s4569_s6, %s5933_s10 }
 0x1b0   : > { %p4572_p12 = pnand %p4570_p11, %p5928_p8 }
 0x1b2   : > { %p4573_p7 = pneg %p4572_p12 }
 0x1b4   : > { %p4578_p10 = pnand %p4576_p9, %p4573_p7 }
 0x1b6   : > { %4581 = shalt.err (!%p4578_p10)
}
 0x1b7   : > { %s4582_s7 = scalar_lea.vmem %s5380_s9, 16  ;;  %s4589_s5 = scalar_lea.vmem %s5380_s9, 32 }
 0x1b8   : > { %p4583_p0 = scmp.ne.s32.totalorder %s5380_s9, %s4582_s7  ;;  %p4590_p3 = scmp.lt.s32.totalorder %s5380_s9, %s5380_s9 }
 0x1b9   : > { %p4591_p13 = scmp.lt.s32.totalorder %s4589_s5, %s4582_s7 }
 0x1ba   : > { %p4585_p5 = pnand %p4583_p0, %p5928_p8 }
 0x1bb   : > { %p4592_p2 = por %p4591_p13, %p4590_p3 }
 0x1bc   : > { %p4586_p1 = pneg %p4585_p5 }
 0x1be   : > { %p4593_p4 = pnand %p4592_p2, %p4586_p1 }
 0x1c0   : > { %4596 = shalt.err (!%p4593_p4)
}
 0x1c1   : > { %4045 = dma.hbm_to_vmem [thread:$0]  (!%p5929_p6), %s5933_s10, 16, %s5380_s9, [#allocation23]  }
 0x1c2   : > { %s4879_s17 = smov [#allocation27]   ;;  %s4880_s14 = smov [#allocation30]  }
 0x1c3   : > { %s657_s18 = sshll.u32 %s4879_s17, 4  ;;  %s681_s6 = sshll.u32 %s4880_s14, 4  ;;  %s658_s18 = int_to_ptr.vmem [resolvable:$true] %s657_s18  ;;  %s5424_s6 = int_to_ptr.vmem [resolvable:$true] %s681_s6 }
 0x1c4   : > { %s5934_s23 = sld [smem:[#allocation65_spill]] }
 0x1ca   : > { %s4597_s15 = scalar_lea.hbm %s5934_s23, 16 }
 0x1cb   : > { %p4598_p11 = scmp.ne.s32.totalorder %s5934_s23, %s4597_s15  ;;  %p4604_p9 = scmp.lt.u32.totalorder %s4597_s15, %s5934_s23 }
 0x1cd   : > { %p4600_p12 = pnand %p4598_p11, %p5928_p8 }
 0x1cf   : > { %p4601_p7 = pneg %p4600_p12 }
 0x1d1   : > { %p4606_p10 = pnand %p4604_p9, %p4601_p7 }
 0x1d3   : > { %4609 = shalt.err (!%p4606_p10)
}
 0x1d4   : > { %s4610_s4 = scalar_lea.vmem %s658_s18, 16  ;;  %s4617_s17 = scalar_lea.vmem %s658_s18, 32 }
 0x1d5   : > { %p4611_p0 = scmp.ne.s32.totalorder %s658_s18, %s4610_s4  ;;  %p4618_p3 = scmp.lt.s32.totalorder %s658_s18, %s658_s18 }
 0x1d6   : > { %p4619_p13 = scmp.lt.s32.totalorder %s4617_s17, %s4610_s4 }
 0x1d7   : > { %p4613_p5 = pnand %p4611_p0, %p5928_p8 }
 0x1d8   : > { %p4620_p2 = por %p4619_p13, %p4618_p3 }
 0x1d9   : > { %p4614_p1 = pneg %p4613_p5 }
 0x1db   : > { %p4621_p4 = pnand %p4620_p2, %p4614_p1 }
 0x1dd   : > { %4624 = shalt.err (!%p4621_p4)
}
 0x1de   : > { %4051 = dma.hbm_to_vmem [thread:$0]  (!%p5929_p6), %s5934_s23, 16, %s658_s18, [#allocation26]  }
 0x1df   : > { %s5935_s7 = sld [smem:[#allocation67_spill]] }
 0x1e5   : > { %s4625_s5 = scalar_lea.hbm %s5935_s7, 16 }
 0x1e6   : > { %p4626_p11 = scmp.ne.s32.totalorder %s5935_s7, %s4625_s5  ;;  %p4632_p9 = scmp.lt.u32.totalorder %s4625_s5, %s5935_s7 }
 0x1e8   : > { %p4628_p12 = pnand %p4626_p11, %p5928_p8 }
 0x1ea   : > { %p4629_p7 = pneg %p4628_p12 }
 0x1ec   : > { %p4634_p10 = pnand %p4632_p9, %p4629_p7 }
 0x1ee   : > { %4637 = shalt.err (!%p4634_p10)
}
 0x1ef   : > { %s4638_s18 = scalar_lea.vmem %s5424_s6, 16  ;;  %s4645_s14 = scalar_lea.vmem %s5424_s6, 32 }
 0x1f0   : > { %p4639_p0 = scmp.ne.s32.totalorder %s5424_s6, %s4638_s18  ;;  %p4646_p3 = scmp.lt.s32.totalorder %s5424_s6, %s5424_s6 }
 0x1f1   : > { %p4647_p13 = scmp.lt.s32.totalorder %s4645_s14, %s4638_s18 }
 0x1f2   : > { %p4641_p5 = pnand %p4639_p0, %p5928_p8 }
 0x1f3   : > { %p4648_p2 = por %p4647_p13, %p4646_p3 }
 0x1f4   : > { %p4642_p1 = pneg %p4641_p5 }
 0x1f6   : > { %p4649_p4 = pnand %p4648_p2, %p4642_p1 }
 0x1f8   : > { %4652 = shalt.err (!%p4649_p4)
}
 0x1f9   : > { %4057 = dma.hbm_to_vmem [thread:$0]  (!%p5929_p6), %s5935_s7, 16, %s5424_s6, [#allocation29]  }
 0x1fa   : > { %s4881_s15 = smov [#allocation33]   ;;  %s5936_s24 = sshll.u32 %s4855_s1, 7 }
 0x1fb   : > { %s703_s5 = sshll.u32 %s4881_s15, 4  ;;  %s5937_s17 = sld [smem:[#allocation51_spill]]  ;;  %s704_s5 = int_to_ptr.vmem [resolvable:$true] %s703_s5 }
 0x1fc   : > { %s5938_s10 = sld [smem:[#allocation69_spill]] }
 0x201   : > { %s5473_s18 = scalar_lea.hbm %s5937_s17, %s5936_s24 }
 0x202   : > { %s4653_s11 = scalar_lea.hbm %s5938_s10, 16 }
 0x203   : > { %p4654_p11 = scmp.ne.s32.totalorder %s5938_s10, %s4653_s11  ;;  %p4660_p9 = scmp.lt.u32.totalorder %s4653_s11, %s5938_s10 }
 0x205   : > { %p4656_p12 = pnand %p4654_p11, %p5928_p8 }
 0x207   : > { %p4657_p7 = pneg %p4656_p12 }
 0x209   : > { %p4662_p10 = pnand %p4660_p9, %p4657_p7 }
 0x20b   : > { %4665 = shalt.err (!%p4662_p10)
}
 0x20c   : > { %s4666_s29 = scalar_lea.vmem %s704_s5, 16  ;;  %s4673_s8 = scalar_lea.vmem %s704_s5, 32 }
 0x20d   : > { %p4667_p0 = scmp.ne.s32.totalorder %s704_s5, %s4666_s29  ;;  %p4674_p3 = scmp.lt.s32.totalorder %s704_s5, %s704_s5 }
 0x20e   : > { %p4675_p13 = scmp.lt.s32.totalorder %s4673_s8, %s4666_s29 }
 0x20f   : > { %p4669_p5 = pnand %p4667_p0, %p5928_p8 }
 0x210   : > { %p4676_p2 = por %p4675_p13, %p4674_p3 }
 0x211   : > { %p4670_p1 = pneg %p4669_p5 }
 0x213   : > { %p4677_p4 = pnand %p4676_p2, %p4670_p1 }
 0x215   : > { %4680 = shalt.err (!%p4677_p4)
}
 0x216   : > { %4063 = dma.hbm_to_vmem [thread:$0]  (!%p5929_p6), %s5938_s10, 16, %s704_s5, [#allocation32]  }
 0x217   : > { %s5939_s12 = sshll.u32 %s5258_s27, 3  ;;  %s3458_s24 = sshll.u32 %s4855_s1, 4 }
 0x218   : > { %s718_s11 = scalar_lea.vmem [#allocation4], %s5939_s12  ;;  %s715_s9 = scalar_lea.sflag [#allocation5], %s5258_s27 }
 0x219   : > { %s726_s15 = sshll.u32 %s718_s11, 4  ;;  %s4681_s3 = scalar_lea.hbm %s5473_s18, 128  ;;  %s5495_s15 = int_to_ptr.vmem [resolvable:$true] %s726_s15 }
 0x21a   : > { %p4682_p8 = scmp.ne.s32.totalorder %s5473_s18, %s4681_s3  ;;  %p5940_p11 = scmp.ne.s32.totalorder %s5926_s13, 0 }
 0x21b   : > { %s4686_s6 = scalar_lea.hbm %s5937_s17, 256  ;;  %p4687_p6 = scmp.lt.u32.totalorder %s5473_s18, %s5937_s17 }
 0x21c   : > { %p4684_p12 = pnand %p4682_p8, %p5940_p11  ;;  %p4688_p9 = scmp.lt.u32.totalorder %s4686_s6, %s4681_s3 }
 0x21d   : > { %p4690_p0 = scmp.lt.u32.totalorder %s4681_s3, %s5473_s18 }
 0x21e   : > { %p4685_p7 = pneg %p4684_p12  ;;  %p4689_p10 = por %p4688_p9, %p4687_p6 }
 0x220   : > { %p4691_p5 = por %p4690_p0, %p4689_p10 }
 0x222   : > { %p4692_p1 = pnand %p4691_p5, %p4685_p7 }
 0x224   : > { %4695 = shalt.err (!%p4692_p1)
}
 0x225   : > { %s4696_s5 = scalar_lea.vmem %s5495_s15, 128  ;;  %s4882_s8 = smov [#allocation4]  }
 0x226   : > { %p4697_p3 = scmp.ne.s32.totalorder %s5495_s15, %s4696_s5  ;;  %s4701_s20 = sshll.u32 %s4882_s8, 4  ;;  %s4702_s20 = int_to_ptr.vmem [resolvable:$false] %s4701_s20 }
 0x227   : > { %s4703_s23 = scalar_lea.vmem %s4702_s20, 256  ;;  %p4704_p4 = scmp.lt.s32.totalorder %s5495_s15, %s4702_s20 }
 0x228   : > { %p4699_p13 = pnand %p4697_p3, %p5940_p11  ;;  %p4705_p8 = scmp.lt.s32.totalorder %s4703_s23, %s4696_s5 }
 0x22a   : > { %p4700_p2 = pneg %p4699_p13  ;;  %p4706_p12 = por %p4705_p8, %p4704_p4 }
 0x22c   : > { %p4707_p6 = pnand %p4706_p12, %p4700_p2 }
 0x22e   : > { %4710 = shalt.err (!%p4707_p6)
}
 0x22f   : > { %p5941_p7 = scmp.ne.s32.totalorder %s5924_s16, 0  ;;  %s5942_s3 = sld [smem:[#allocation53_spill]] }
 0x230   : > { %s754_s14 = scalar_lea.vmem [#allocation9], %s5258_s27 }
 0x231   : > { %4067 = dma.hbm_to_vmem [thread:$0]  (!%p5941_p7), %s5473_s18, 128, %s5495_s15, %s715_s9  }
 0x232   : > { %s761_s6 = sshll.u32 %s754_s14, 4  ;;  %s762_s6 = int_to_ptr.vmem [resolvable:$true] %s761_s6 }
 0x235   : > { %s5525_s4 = scalar_lea.hbm %s5942_s3, %s3458_s24  ;;  %s4716_s15 = scalar_lea.hbm %s5942_s3, 32 }
 0x236   : > { %s4711_s19 = scalar_lea.hbm %s5525_s4, 16  ;;  %p4717_p5 = scmp.lt.u32.totalorder %s5525_s4, %s5942_s3 }
 0x237   : > { %p4712_p9 = scmp.ne.s32.totalorder %s5525_s4, %s4711_s19  ;;  %p4718_p1 = scmp.lt.u32.totalorder %s4716_s15, %s4711_s19 }
 0x238   : > { %p4720_p13 = scmp.lt.u32.totalorder %s4711_s19, %s5525_s4 }
 0x239   : > { %p4714_p10 = pnand %p4712_p9, %p5940_p11  ;;  %p4719_p3 = por %p4718_p1, %p4717_p5 }
 0x23b   : > { %p4715_p0 = pneg %p4714_p10  ;;  %p4721_p2 = por %p4720_p13, %p4719_p3 }
 0x23d   : > { %p4722_p4 = pnand %p4721_p2, %p4715_p0 }
 0x23f   : > { %4725 = shalt.err (!%p4722_p4)
}
 0x240   : > { %s4726_s27 = scalar_lea.vmem %s762_s6, 16  ;;  %s4883_s24 = smov [#allocation9]  }
 0x241   : > { %p4727_p8 = scmp.ne.s32.totalorder %s762_s6, %s4726_s27  ;;  %s4731_s8 = sshll.u32 %s4883_s24, 4  ;;  %s4732_s8 = int_to_ptr.vmem [resolvable:$false] %s4731_s8 }
 0x242   : > { %s4733_s20 = scalar_lea.vmem %s4732_s8, 32  ;;  %p4734_p9 = scmp.lt.s32.totalorder %s762_s6, %s4732_s8 }
 0x243   : > { %p4729_p12 = pnand %p4727_p8, %p5940_p11  ;;  %p4735_p10 = scmp.lt.s32.totalorder %s4733_s20, %s4726_s27 }
 0x245   : > { %p4730_p6 = pneg %p4729_p12  ;;  %p4736_p7 = por %p4735_p10, %p4734_p9 }
 0x247   : > { %p4737_p1 = pnand %p4736_p7, %p4730_p6 }
 0x249   : > { %4740 = shalt.err (!%p4737_p1)
}
 0x24a   : > { %p5943_p5 = scmp.ne.s32.totalorder %s5924_s16, 0  ;;  %s5944_s23 = sld [smem:[#allocation48_spill]] }
 0x24c   : > { %4073 = dma.hbm_to_vmem [thread:$0]  (!%p5943_p5), %s5525_s4, 16, %s762_s6, %s5280_s21  }
 0x250   : > { %p5945_p0 = scmp.ne.s32.totalorder %s5944_s23, 0 }
 0x251   : > { %s5549_s13 = sand.u32 (!%p5945_p0), 1, %s4843_s30   ;;  %p5946_p11 = scmp.ne.s32.totalorder (!%p5945_p0), %s5920_s26, 0 }
 0x252   : > { %770 = sbr.rel (%p5945_p0) target bundleno = 5160 (0x1428), region = 96  ;;  %s5552_s12 = sshll.u32 (!%p5945_p0), %s5549_s13, 3 }
 0x253   : > { %s773_s11 = scalar_lea.sflag (!%p5945_p0), [#allocation5], %s5549_s13  ;;  %s776_s14 = scalar_lea.vmem (!%p5945_p0), [#allocation4], %s5552_s12 }
 0x259   : > { %4794 = dma.done.wait (%p5946_p11), %s773_s11, 128  }
 0x25a   : > { %4796 = vsyncadd (%p5946_p11), %s773_s11, 4294967168  ;;  %s781_s16 = sand.u32 1, %s5019_s2   ;;  %s785_s4 = scalar_lea.vmem [#allocation7], %s5552_s12 }
 0x25b   : > { %s782_s21 = scalar_lea.sflag [#allocation8], %s781_s16 }
 0x25c   : > { %4798 = dma.done.wait (%p5946_p11), %s782_s21, 144  }
 0x25d   : > { %4800 = vsyncadd (%p5946_p11), %s782_s21, 4294967152  ;;  %s793_s6 = scalar_lea.vmem [#allocation9], %s5549_s13  ;;  %p5947_p7 = scmp.eq.s32.totalorder %s5019_s2, 0 }
 0x25f   : > { %4802 = dma.done.wait (%p5947_p7), [#allocation11], 2112   ;;  %p5948_p3 = pmov %p5947_p7 }
 0x261   : > { %4804 = vsyncadd (%p5948_p3), [#allocation11], 4294965184  ;;  %p5949_p13 = pmov %p5948_p3 }
 0x262   : > { %p5950_p2 = pmov %p5948_p3 }
 0x263   : > { %4806 = dma.done.wait (%p5949_p13), [#allocation14], 2112  }
 0x264   : > { %4808 = vsyncadd (%p5950_p2), [#allocation14], 4294965184  ;;  %p5951_p4 = pmov %p5950_p2 }
 0x265   : > { %p5952_p8 = pmov %p5950_p2 }
 0x266   : > { %4810 = dma.done.wait (%p5951_p4), [#allocation17], 2112  }
 0x267   : > { %4812 = vsyncadd (%p5952_p8), [#allocation17], 4294965184  ;;  %p5953_p12 = pmov %p5950_p2 }
 0x268   : > { %p5954_p6 = pmov %p5950_p2 }
 0x269   : > { %4814 = dma.done.wait (%p5953_p12), [#allocation20], 528  }
 0x26a   : > { %4816 = vsyncadd (%p5954_p6), [#allocation20], 4294966768  ;;  %p5955_p9 = pmov %p5950_p2 }
 0x26b   : > { %p5956_p10 = pmov %p5950_p2 }
 0x26c   : > { %4818 = dma.done.wait (%p5955_p9), [#allocation23], 32  }
 0x26d   : > { %4820 = vsyncadd (%p5956_p10), [#allocation23], 4294967264  ;;  %p5957_p1 = pmov %p5950_p2 }
 0x26f   : > { %4822 = dma.done.wait (%p5957_p1), [#allocation26], 528   ;;  %p5958_p5 = pmov %p5957_p1 }
 0x270   : > { %p5959_p0 = pmov %p5957_p1 }
 0x271   : > { %4824 = vsyncadd (%p5958_p5), [#allocation26], 4294966768 }
 0x272   : > { %4826 = dma.done.wait (%p5959_p0), [#allocation29], 1040   ;;  %p5960_p11 = pmov %p5959_p0 }
 0x273   : > { %p5961_p7 = pmov %p5959_p0 }
 0x274   : > { %4828 = vsyncadd (%p5960_p11), [#allocation29], 4294966256 }
 0x275   : > { %4830 = dma.done.wait (%p5961_p7), [#allocation32], 32   ;;  %p5962_p3 = pmov %p5959_p0 }
 0x276   : > { %v4884_v0 = vmov 0.0|0.0   ;;  %vm4885_vm0 = vmmov 0   ;;  %v4886_v1 = vmov 0.0   ;;  %v926_v2 = vld [vmem:[#allocation13] sm:$0xff]  ;;  %v927_v3 = vld [vmem:[#allocation13 + $0x8] sm:$0xff]  ;;  %v928_v4 = vld [vmem:[#allocation13 + $0x10] sm:$0xff] }
 0x277   : > { %4832 = vsyncadd (%p5962_p3), [#allocation32], 4294967264  ;;  %3853 = vmatprep.subr.bf16.mxu0 %v4884_v0  ;;  %3639 = vmatprep.mubr.msk.f32.mxu0 %vm4885_vm0, %v4886_v1  ;;  %v3854_v5 = vpack.c.bf16 %v927_v3, %v926_v2  ;;  %v929_v6 = vld [vmem:[#allocation13 + $0x18] sm:$0xff]  ;;  %v1096_v8 = vld [vmem:[#allocation13 + $0x20] sm:$0xff]  ;;  %vm937_vm1 = vcmask 261120   ;;  %vm1011_vm2 = vcmask 64512  }
 0x278   : > { %3859 = vmatprep.subr.bf16.mxu1 %v4884_v0  ;;  %3650 = vmatprep.mubr.msk.f32.mxu1 %vm4885_vm0, %v4886_v1  ;;  %v3857_v7 = vpack.c.bf16 %v929_v6, %v928_v4  ;;  %v1097_v9 = vld [vmem:[#allocation13 + $0x28] sm:$0xff]  ;;  %v1098_v12 = vld [vmem:[#allocation13 + $0x30] sm:$0xff]  ;;  %v1099_v13 = vld [vmem:[#allocation13 + $0x38] sm:$0xff]  ;;  %vm3042_vm3 = vcmask 523264   ;;  %s5963_s2 = sld [smem:[#allocation47_spill]]  ;;  %s920_s19 = scalar_lea.vmem [#allocation34], %s5552_s12 }
 0x279   : > { %3855 = vmatpush3.bf16.msra.mxu0 %v3854_v5  ;;  %v5608_v10 = vld [vmem:[%s785_s4] sm:$0xff]  ;;  %v3866_v11 = vpack.c.bf16 %v1097_v9, %v1096_v8  ;;  %v3869_v14 = vpack.c.bf16 %v1099_v13, %v1098_v12  ;;  %v1266_v15 = vld [vmem:[#allocation13 + $0x40] sm:$0xff]  ;;  %v3495_v51 = vld [vmem:[#allocation12] ss:$0 sm:$0xff]  ;;  %s3162_s29 = sshll.u32 %s920_s19, 4  ;;  %s5964_s9 = sld [smem:[#allocation70_spill]]  ;;  %s5778_s29 = int_to_ptr.vmem [resolvable:$true] %s3162_s29 }
 0x27a   : > { %3856 = vmatprep.subr.bf16.mxu0 %v4884_v0  ;;  %v1267_v16 = vld [vmem:[#allocation13 + $0x48] sm:$0xff]  ;;  %v1268_v18 = vld [vmem:[#allocation13 + $0x50] sm:$0xff]  ;;  %v1269_v19 = vld [vmem:[#allocation13 + $0x58] sm:$0xff]  ;;  %s3148_s27 = scalar_lea.sflag [#allocation6], %s5549_s13  ;;  %s4741_s24 = scalar_lea.vmem %s5778_s29, 128 }
 0x27b   : > { %v3878_v17 = vpack.c.bf16 %v1267_v16, %v1266_v15  ;;  %v3881_v20 = vpack.c.bf16 %v1269_v19, %v1268_v18  ;;  %v1436_v21 = vld [vmem:[#allocation13 + $0x60] sm:$0xff]  ;;  %v1437_v22 = vld [vmem:[#allocation13 + $0x68] sm:$0xff]  ;;  %v1438_v24 = vld [vmem:[#allocation13 + $0x70] sm:$0xff]  ;;  %p4742_p13 = scmp.ne.s32.totalorder %s5778_s29, %s4741_s24  ;;  %p5965_p2 = scmp.ne.s32.totalorder %s5921_s28, 0 }
 0x27c   : > { %v3890_v23 = vpack.c.bf16 %v1437_v22, %v1436_v21  ;;  %v1439_v25 = vld [vmem:[#allocation13 + $0x78] sm:$0xff]  ;;  %v1608_v28 = vld [vmem:[#allocation10 + $0x8] sm:$0xff]  ;;  %v1609_v30 = vld [vmem:[#allocation10 + $0x10] sm:$0xff]  ;;  %s4887_s8 = smov [#allocation34]  }
 0x27d   : > { %3858 = vmatpush3.bf16.msra.mxu0 %v3857_v7  ;;  %v3893_v26 = vpack.c.bf16 %v1439_v25, %v1438_v24  ;;  %v1607_v27 = vld [vmem:[#allocation10] sm:$0xff]  ;;  %v1610_v31 = vld [vmem:[#allocation10 + $0x18] sm:$0xff]  ;;  %v1013_v55 = vld [vmem:[#allocation16] sm:$0xff]  ;;  %p4743_p4 = pnand %p4742_p13, %p5965_p2  ;;  %s4745_s20 = sshll.u32 %s4887_s8, 4  ;;  %s4746_s20 = int_to_ptr.vmem [resolvable:$false] %s4745_s20 }
 0x27e   : > { %3865 = vmatprep.subr.bf16.mxu0 %v4884_v0  ;;  %v3902_v29 = vpack.c.bf16 %v1608_v28, %v1607_v27  ;;  %v3905_v32 = vpack.c.bf16 %v1610_v31, %v1609_v30  ;;  %v5636_v33 = vld [vmem:[%s776_s14] sm:$0xff]  ;;  %v1014_v56 = vld [vmem:[#allocation16 + $0x8] sm:$0xff]  ;;  %s3530_s26 = sshll.u32 %s5963_s2, 7  ;;  %s4747_s23 = scalar_lea.vmem %s4746_s20, 256 }
 0x27f   : > { %v3479_v34 = vld [vmem:[#allocation15] ss:$0 sm:$0xff]  ;;  %v3483_v38 = vld [vmem:[#allocation15 + $0x1] ss:$0 sm:$0xff]  ;;  %v3487_v43 = vld [vmem:[#allocation15 + $0x2] ss:$0 sm:$0xff]  ;;  %v3860_v58 = vpack.c.bf16 %v1014_v56, %v1013_v55  ;;  %s5776_s5 = scalar_lea.hbm %s5964_s9, %s3530_s26  ;;  %p4744_p8 = pneg %p4743_p4 }
 0x280   : > { %3640 = vmatmul.mubr.msk.f32.vlgmr.msra.gmra.mrb[0].mxu0 %vm937_vm1, %v5608_v10  ;;  %v3491_v47 = vld [vmem:[#allocation15 + $0x3] ss:$0 sm:$0xff]  ;;  %v1015_v57 = vld [vmem:[#allocation16 + $0x10] sm:$0xff]  ;;  %v1864_v61 = vld [vmem:[#allocation10 + $0x28] sm:$0xff]  ;;  %p4748_p12 = scmp.lt.s32.totalorder %s5778_s29, %s4746_s20  ;;  %p4749_p6 = scmp.lt.s32.totalorder %s4747_s23, %s4741_s24 }
 0x281   : > { %3867 = vmatpush3.bf16.msra.mxu0 %v3866_v11  ;;  %3661 = vmatprep.mubr.msk.f32.mxu0 %vm4885_vm0, %v4886_v1  ;;  %v1016_v59 = vld [vmem:[#allocation16 + $0x18] sm:$0xff]  ;;  %v1865_v63 = vld [vmem:[#allocation10 + $0x30] sm:$0xff]  ;;  %v1866_v2 = vld [vmem:[#allocation10 + $0x38] sm:$0xff] }
 0x282   : > { %3868 = vmatprep.subr.bf16.mxu0 %v4884_v0  ;;  %v1863_v60 = vld [vmem:[#allocation10 + $0x20] sm:$0xff]  ;;  %3861 = vmatpush3.bf16.msra.mxu1 %v3860_v58  ;;  %v3863_v3 = vpack.c.bf16 %v1016_v59, %v1015_v57  ;;  %v3911_v4 = vpack.c.bf16 %v1866_v2, %v1865_v63  ;;  %v5666_v5 = vld [vmem:[%s793_s6] ss:$0 sm:$0xff]  ;;  %v1181_v11 = vld [vmem:[#allocation16 + $0x20] sm:$0xff]  ;;  %p4750_p9 = por %p4749_p6, %p4748_p12 }
 0x283   : > { %v3908_v62 = vpack.c.bf16 %v1864_v61, %v1863_v60  ;;  %3862 = vmatprep.subr.bf16.mxu1 %v4884_v0  ;;  %v1182_v12 = vld [vmem:[#allocation16 + $0x28] sm:$0xff]  ;;  %v1183_v13 = vld [vmem:[#allocation16 + $0x30] sm:$0xff]  ;;  %v1184_v15 = vld [vmem:[#allocation16 + $0x38] sm:$0xff] }
 0x284   : > { %v3875_v16 = vpack.c.bf16 %v1184_v15, %v1183_v13  ;;  %v1352_v18 = vld [vmem:[#allocation16 + $0x48] sm:$0xff]  ;;  %v1354_v21 = vld [vmem:[#allocation16 + $0x58] sm:$0xff]  ;;  %v3493_v56 = vld [vmem:[#allocation18 + $0x3] ss:$0 sm:$0xff]  ;;  %p4751_p10 = pnand %p4750_p9, %p4744_p8 }
 0x285   : > { %3870 = vmatpush3.bf16.msra.mxu0 %v3869_v14  ;;  %v3872_v14 = vpack.c.bf16 %v1182_v12, %v1181_v11  ;;  %v1522_v24 = vld [vmem:[#allocation16 + $0x68] sm:$0xff] }
 0x286   : > { %3877 = vmatprep.subr.bf16.mxu0 %v4884_v0  ;;  %3864 = vmatpush3.bf16.msra.mxu1 %v3863_v3  ;;  %v2110_v11 = vld [vmem:[#allocation19 + $0x8] sm:$0xff]  ;;  %v1861_v15 = vld [vmem:[#allocation19] sm:$0xff] }
 0x287   : > { %3871 = vmatprep.subr.bf16.mxu1 %v4884_v0 }
 0x288   : > { %3662 = vmatmul.mubr.msk.f32.vlgmr.msra.gmra.mrb[2].mxu0 %vm937_vm1, %v5608_v10 }
 0x289   : > { %3879 = vmatpush3.bf16.msra.mxu0 %v3878_v17  ;;  %3683 = vmatprep.mubr.msk.f32.mxu0 %vm4885_vm0, %v4886_v1  ;;  %v1351_v17 = vld [vmem:[#allocation16 + $0x40] sm:$0xff] }
 0x28a   : > { %3880 = vmatprep.subr.bf16.mxu0 %v4884_v0  ;;  %3651 = vmatmul.mubr.msk.f32.vlgmr.msra.gmra.mrb[0].mxu1 %vm937_vm1, %v5608_v10  ;;  %v3884_v19 = vpack.c.bf16 %v1352_v18, %v1351_v17  ;;  %v2258_v17 = vld [vmem:[#allocation10 + $0x40] sm:$0xff]  ;;  %v2259_v18 = vld [vmem:[#allocation10 + $0x48] sm:$0xff] }
 0x28b   : > { %3672 = vmatprep.mubr.msk.f32.mxu1 %vm4885_vm0, %v4886_v1  ;;  %3873 = vmatpush3.bf16.msra.mxu1 %v3872_v14 }
 0x28c   : > { %3874 = vmatprep.subr.bf16.mxu1 %v4884_v0 }
 0x28d   : > { %3882 = vmatpush3.bf16.msra.mxu0 %v3881_v20  ;;  %v1353_v20 = vld [vmem:[#allocation16 + $0x50] sm:$0xff] }
 0x28e   : > { %3889 = vmatprep.subr.bf16.mxu0 %v4884_v0  ;;  %v3887_v22 = vpack.c.bf16 %v1354_v21, %v1353_v20  ;;  %v2260_v20 = vld [vmem:[#allocation10 + $0x50] sm:$0xff]  ;;  %v2261_v21 = vld [vmem:[#allocation10 + $0x58] sm:$0xff] }
 0x28f   : > { %3876 = vmatpush3.bf16.msra.mxu1 %v3875_v16 }
 0x290   : > { %3684 = vmatmul.mubr.msk.f32.vlgmr.msra.gmra.mrb[4].mxu0 %vm937_vm1, %v5608_v10  ;;  %3883 = vmatprep.subr.bf16.mxu1 %v4884_v0 }
 0x291   : > { %3891 = vmatpush3.bf16.msra.mxu0 %v3890_v23  ;;  %3705 = vmatprep.mubr.msk.f32.mxu0 %vm4885_vm0, %v4886_v1  ;;  %v1521_v23 = vld [vmem:[#allocation16 + $0x60] sm:$0xff] }
 0x292   : > { %3892 = vmatprep.subr.bf16.mxu0 %v4884_v0  ;;  %3673 = vmatmul.mubr.msk.f32.vlgmr.msra.gmra.mrb[2].mxu1 %vm937_vm1, %v5608_v10  ;;  %v3896_v25 = vpack.c.bf16 %v1522_v24, %v1521_v23  ;;  %v3917_v24 = vpack.c.bf16 %v2261_v21, %v2260_v20  ;;  %v3520_v20 = vld [vmem:[#allocation21] ss:$0 sm:$0xff] }
 0x293   : > { %3885 = vmatpush3.bf16.msra.mxu1 %v3884_v19  ;;  %3694 = vmatprep.mubr.msk.f32.mxu1 %vm4885_vm0, %v4886_v1  ;;  %v3914_v19 = vpack.c.bf16 %v2259_v18, %v2258_v17 }
 0x294   : > { %3886 = vmatprep.subr.bf16.mxu1 %v4884_v0 }
 0x295   : > { %3894 = vmatpush3.bf16.msra.mxu0 %v3893_v26  ;;  %v3481_v26 = vld [vmem:[#allocation18] ss:$0 sm:$0xff] }
 0x296   : > { %3901 = vmatprep.subr.bf16.mxu0 %v4884_v0 }
 0x297   : > { %3888 = vmatpush3.bf16.msra.mxu1 %v3887_v22 }
 0x298   : > { %3706 = vmatmul.mubr.msk.f32.vlgmr.msra.gmra.mrb[6].mxu0 %vm937_vm1, %v5608_v10  ;;  %3895 = vmatprep.subr.bf16.mxu1 %v4884_v0 }
 0x299   : > { %3903 = vmatpush3.bf16.msra.mxu0 %v3902_v29  ;;  %3727 = vmatprep.mubr.msk.f32.mxu0 %vm4885_vm0, %v4886_v1 }
 0x29a   : > { %3904 = vmatprep.subr.bf16.mxu0 %v4884_v0  ;;  %3695 = vmatmul.mubr.msk.f32.vlgmr.msra.gmra.mrb[4].mxu1 %vm937_vm1, %v5608_v10 }
 0x29b   : > { %3897 = vmatpush3.bf16.msra.mxu1 %v3896_v25  ;;  %3716 = vmatprep.mubr.msk.f32.mxu1 %vm4885_vm0, %v4886_v1 }
 0x29c   : > { %3898 = vmatprep.subr.bf16.mxu1 %v4884_v0 }
 0x29d   : > { %3906 = vmatpush3.bf16.msra.mxu0 %v3905_v32 }
 0x29e   : > { %3730 = vmatprep.subr.mxu0 %v4886_v1 }
 0x2a0   : > { %3728 = vmatmul.mubr.msk.f32.vlgmr.msra.gmra.mrb[8].mxu0 %vm937_vm1, %v5636_v33 }
 0x2a1   : > { %3732 = vmatprep.mubr.msk.f32.mxu0 %vm4885_vm0, %v4886_v1 }
 0x353   : > { %v1007_v35 = vpop.f32.mrb[0].mxu0 }
 0x354   : > { %v1008_v36 = vadd.f32 %v3479_v34, %v1007_v35  ;;  %v3641_v37 = vpop.f32.mrb[1].mxu0 }
 0x355   : > { %v1524_v37 = vld [vmem:[#allocation16 + $0x78] sm:$0xff] }
 0x356   : > { %1012 = vst.msk [vmem:[#allocation2] sm:$0xff] %vm1011_vm2, %v1008_v36  ;;  %v1523_v36 = vld [vmem:[#allocation16 + $0x70] sm:$0xff] }
 0x35b   : > { %v1174_v39 = vpop.f32.mrb[2].mxu0 }
 0x35c   : > { %v1175_v40 = vadd.f32 %v3483_v38, %v1174_v39  ;;  %v3663_v41 = vpop.f32.mrb[3].mxu0  ;;  %v3899_v38 = vpack.c.bf16 %v1524_v37, %v1523_v36 }
 0x35d   : > { %v1692_v42 = vld [vmem:[#allocation2] sm:$0xff]  ;;  %v1090_v27 = vpop.f32.mrb[0].mxu1 }
 0x35e   : > { %1179 = vst.msk [vmem:[#allocation2 + $0x8] sm:$0xff] %vm1011_vm2, %v1175_v40  ;;  %3731 = vmatpush3.xpose.msk.msra.mxu0 %vm1011_vm2, %v1692_v42  ;;  %v1091_v28 = vadd.f32 %v3481_v26, %v1090_v27  ;;  %v3652_v29 = vpop.f32.mrb[1].mxu1  ;;  %3900 = vmatpush3.bf16.msra.mxu1 %v3899_v38  ;;  %v3485_v42 = vld [vmem:[#allocation18 + $0x1] ss:$0 sm:$0xff] }
 0x35f   : > { %3907 = vmatprep.subr.bf16.mxu0 %v4884_v0  ;;  %3735 = vmatprep.subr.mxu1 %v4886_v1 }
 0x360   : > { %1094 = vst.msk [vmem:[#allocation3] sm:$0xff] %vm1011_vm2, %v1091_v28 }
 0x361   : > { %3717 = vmatmul.mubr.msk.f32.vlgmr.msra.gmra.mrb[6].mxu1 %vm937_vm1, %v5608_v10 }
 0x362   : > { %3737 = vmatprep.mubr.msk.f32.mxu1 %vm4885_vm0, %v4886_v1 }
 0x363   : > { %v1344_v44 = vpop.f32.mrb[4].mxu0 }
 0x364   : > { %v1345_v45 = vadd.f32 %v3487_v43, %v1344_v44  ;;  %v3685_v46 = vpop.f32.mrb[5].mxu0 }
 0x365   : > { %v1259_v43 = vpop.f32.mrb[2].mxu1  ;;  %v3489_v46 = vld [vmem:[#allocation18 + $0x2] ss:$0 sm:$0xff] }
 0x366   : > { %1349 = vst.msk [vmem:[#allocation2 + $0x10] sm:$0xff] %vm1011_vm2, %v1345_v45  ;;  %v1260_v44 = vadd.f32 %v3485_v42, %v1259_v43  ;;  %v3674_v45 = vpop.f32.mrb[3].mxu1 }
 0x367   : > { %v1787_v39 = vld [vmem:[#allocation3] sm:$0xff] }
 0x368   : > { %3736 = vmatpush3.msra.mxu1 %v1787_v39  ;;  %1264 = vst.msk [vmem:[#allocation3 + $0x8] sm:$0xff] %vm1011_vm2, %v1260_v44  ;;  %v2505_v45 = vld [vmem:[#allocation19 + $0x10] sm:$0xff] }
 0x369   : > { %3751 = vmatprep.subr.mxu1 %v4886_v1 }
 0x36b   : > { %v1514_v48 = vpop.f32.mrb[6].mxu0 }
 0x36c   : > { %v1515_v49 = vadd.f32 %v3491_v47, %v1514_v48  ;;  %v3707_v50 = vpop.f32.mrb[7].mxu0 }
 0x36d   : > { %v1429_v47 = vpop.f32.mrb[4].mxu1  ;;  %v2341_v16 = vld [vmem:[#allocation2 + $0x10] sm:$0xff] }
 0x36e   : > { %1519 = vst.msk [vmem:[#allocation2 + $0x18] sm:$0xff] %vm1011_vm2, %v1515_v49  ;;  %v1430_v48 = vadd.f32 %v3489_v46, %v1429_v47  ;;  %v3696_v49 = vpop.f32.mrb[5].mxu1  ;;  %v2581_v47 = vld [vmem:[#allocation10 + $0x60] sm:$0xff] }
 0x36f   : > { %v2035_v55 = vld [vmem:[#allocation3 + $0x8] sm:$0xff] }
 0x370   : > { %1434 = vst.msk [vmem:[#allocation3 + $0x10] sm:$0xff] %vm1011_vm2, %v1430_v48  ;;  %v2582_v48 = vld [vmem:[#allocation10 + $0x68] sm:$0xff] }
 0x373   : > { %v1688_v52 = vpop.f32.mrb[8].mxu0 }
 0x374   : > { %v1689_v53 = vadd.f32 %v3495_v51, %v1688_v52  ;;  %v3729_v54 = vpop.f32.mrb[9].mxu0  ;;  %v3501_v51 = vld [vmem:[#allocation12 + $0x1] ss:$0 sm:$0xff] }
 0x375   : > { %v1946_v54 = vld [vmem:[#allocation2 + $0x8] sm:$0xff] }
 0x376   : > { %3733 = vmatmul.mubr.msk.f32.vlgmr.msra.gmra.mrb[10].mxu0 %vm1011_vm2, %v1689_v53 }
 0x377   : > { %3748 = vmatprep.mubr.msk.f32.mxu0 %vm4885_vm0, %v4886_v1  ;;  %3909 = vmatpush3.bf16.msra.mxu0 %v3908_v62 }
 0x378   : > { %3910 = vmatprep.subr.bf16.mxu0 %v4884_v0 }
 0x37b   : > { %3912 = vmatpush3.bf16.msra.mxu0 %v3911_v4 }
 0x37c   : > { %3761 = vmatprep.subr.mxu0 %v4886_v1 }
 0x37e   : > { %3749 = vmatmul.mubr.msk.f32.vlgmr.msra.gmra.mrb[12].mxu0 %vm937_vm1, %v5636_v33 }
 0x37f   : > { %3763 = vmatprep.mubr.msk.f32.mxu0 %vm4885_vm0, %v4886_v1  ;;  %3762 = vmatpush3.msra.mxu0 %v2110_v11 }
 0x380   : > { %3913 = vmatprep.subr.bf16.mxu0 %v4884_v0 }
 0x434   : > { %v1599_v57 = vpop.f32.mrb[6].mxu1 }
 0x435   : > { %v1600_v58 = vadd.f32 %v3493_v56, %v1599_v57  ;;  %v3718_v59 = vpop.f32.mrb[7].mxu1  ;;  %v2664_v56 = vld [vmem:[#allocation2 + $0x18] sm:$0xff]  ;;  %v3514_v57 = vld [vmem:[#allocation12 + $0x3] ss:$0 sm:$0xff] }
 0x437   : > { %1604 = vst.msk [vmem:[#allocation3 + $0x18] sm:$0xff] %vm1011_vm2, %v1600_v58 }
 0x449   : > { %v1772_v6 = vpop.f32.mrb[10].mxu0 }
 0x44a   : > { %v1773_v7 = vadd.f32 %v5666_v5, %v1772_v6  ;;  %v3734_v8 = vpop.f32.mrb[11].mxu0 }
 0x44c   : > { %v1776_v9 = vsel %vm1011_vm2, %v1773_v7, -inf }
 0x44d   : > { %1777 = vmax.xlane.f32.xlu0 %v1776_v9 }
 0x451   : > { %v1941_v40 = vpop.f32.mrb[12].mxu0 }
 0x452   : > { %v3750_v41 = vpop.f32.mrb[13].mxu0  ;;  %v1942_v53 = vadd.f32 %v3501_v51, %v1941_v40  ;;  %v2583_v51 = vld [vmem:[#allocation10 + $0x70] sm:$0xff] }
 0x4da   : > { %v1778_v30 = vpop.xlane.xlu0 %1777 }
 0x4db   : > { %v1779_v31 = vsub.f32 %v1773_v7, %v1778_v30  ;;  %v3508_v30 = vld [vmem:[#allocation12 + $0x2] ss:$0 sm:$0xff] }
 0x4dd   : > { %v1780_v32 = vmul.f32 1.442695, %v1779_v31 }
 0x4df   : > { %4183 = vpow2.f32 %v1780_v32 }
 0x4e9   : > { %v4184_v34 = vpop.eup %4183 }
 0x4ea   : > { %v1782_v35 = vsel %vm1011_vm2, %v4184_v34, 0.0 }
 0x4eb   : > { %1783 = vadd.xlane.f32.xlu0 %v1782_v35  ;;  %v2430_v35 = vld [vmem:[#allocation3 + $0x10] sm:$0xff] }
 0x578   : > { %v1784_v10 = vpop.xlane.xlu0 %1783 }
 0x579   : > { %4185 = vrcp.f32 %v1784_v10  ;;  %v3920_v10 = vpack.c.bf16 %v2582_v48, %v2581_v47 }
 0x583   : > { %v4186_v50 = vpop.eup %4185 }
 0x584   : > { %v1786_v52 = vmul.f32 %v4186_v50, %v4184_v34 }
 0x586   : > { %3738 = vmatmul.mubr.msk.f32.vlgmr.msra.gmra.mrb[8].mxu1 %vm1011_vm2, %v1786_v52  ;;  %v2584_v52 = vld [vmem:[#allocation10 + $0x78] sm:$0xff] }
 0x587   : > { %3752 = vmatpush3.xpose.msk.msra.mxu1 %vm1011_vm2, %v1946_v54  ;;  %3753 = vmatprep.mubr.msk.f32.mxu1 %vm4885_vm0, %v4886_v1 }
 0x588   : > { %3756 = vmatprep.subr.mxu1 %v4886_v1 }
 0x58a   : > { %3754 = vmatmul.mubr.msk.f32.vlgmr.msra.gmra.mrb[10].mxu1 %vm1011_vm2, %v1942_v53  ;;  %v3923_v53 = vpack.c.bf16 %v2584_v52, %v2583_v51 }
 0x58b   : > { %3757 = vmatpush3.msra.mxu1 %v2035_v55  ;;  %3758 = vmatprep.mubr.msk.f32.mxu1 %vm4885_vm0, %v4886_v1 }
 0x58c   : > { %3766 = vmatprep.subr.mxu1 %v4886_v1 }
 0x659   : > { %v1857_v60 = vpop.f32.mrb[8].mxu1 }
 0x65a   : > { %v3739_v61 = vpop.f32.mrb[9].mxu1 }
 0x65b   : > { %v2753_v61 = vld [vmem:[#allocation3 + $0x18] sm:$0xff] }
 0x65d   : > { %v2019_v62 = vpop.f32.mrb[10].mxu1 }
 0x65e   : > { %v2020_v63 = vadd.f32 %v5666_v5, %v2019_v62  ;;  %v3755_v2 = vpop.f32.mrb[11].mxu1 }
 0x660   : > { %v2023_v3 = vsel %vm1011_vm2, %v2020_v63, -inf }
 0x661   : > { %2024 = vmax.xlane.f32.xlu1 %v2023_v3 }
 0x6ee   : > { %v2025_v4 = vpop.xlane.xlu1 %2024 }
 0x6ef   : > { %v2026_v6 = vsub.f32 %v2020_v63, %v2025_v4 }
 0x6f1   : > { %v2027_v7 = vmul.f32 1.442695, %v2026_v6 }
 0x6f3   : > { %4187 = vpow2.f32 %v2027_v7 }
 0x6fd   : > { %v4188_v8 = vpop.eup %4187 }
 0x6fe   : > { %v2029_v9 = vsel %vm1011_vm2, %v4188_v8, 0.0 }
 0x6ff   : > { %2030 = vadd.xlane.f32.xlu1 %v2029_v9 }
 0x78c   : > { %v2031_v12 = vpop.xlane.xlu1 %2030 }
 0x78d   : > { %4189 = vrcp.f32 %v2031_v12 }
 0x797   : > { %v4190_v13 = vpop.eup %4189 }
 0x798   : > { %v2033_v14 = vmul.f32 %v4190_v13, %v4188_v8 }
 0x79a   : > { %3759 = vmatmul.mubr.msk.f32.vlgmr.msra.gmra.mrb[12].mxu1 %vm1011_vm2, %v2033_v14  ;;  %v2828_v14 = vld [vmem:[#allocation19 + $0x18] sm:$0xff] }
 0x79b   : > { %3767 = vmatpush3.msra.mxu1 %v1861_v15  ;;  %3768 = vmatprep.mubr.msk.f32.mxu1 %vm4885_vm0, %v4886_v1 }
 0x79c   : > { %3782 = vmatprep.subr.mxu1 %v4886_v1 }
 0x79e   : > { %3769 = vmatmul.mubr.msk.f32.vlgmr.msra.gmra.mrb[14].mxu1 %vm1011_vm2, %v1857_v60 }
 0x79f   : > { %3784 = vmatprep.mubr.msk.f32.mxu1 %vm4885_vm0, %v4886_v1 }
 0x7a2   : > { %3783 = vmatpush3.xpose.msk.msra.mxu1 %vm1011_vm2, %v2341_v16 }
 0x7a3   : > { %3787 = vmatprep.subr.mxu1 %v4886_v1 }
 0x86d   : > { %v2105_v22 = vpop.f32.mrb[12].mxu1 }
 0x86e   : > { %v3760_v23 = vpop.f32.mrb[13].mxu1  ;;  %3764 = vmatmul.mubr.msk.f32.vlgmr.msra.gmra.mrb[14].mxu0 %vm1011_vm2, %v2105_v22 }
 0x86f   : > { %3915 = vmatpush3.bf16.msra.mxu0 %v3914_v19  ;;  %3779 = vmatprep.mubr.msk.f32.mxu0 %vm4885_vm0, %v4886_v1 }
 0x870   : > { %3916 = vmatprep.subr.bf16.mxu0 %v4884_v0 }
 0x871   : > { %v2253_v25 = vpop.f32.mrb[14].mxu1 }
 0x872   : > { %v3770_v26 = vpop.f32.mrb[15].mxu1 }
 0x873   : > { %3918 = vmatpush3.bf16.msra.mxu0 %v3917_v24 }
 0x874   : > { %3792 = vmatprep.subr.mxu0 %v4886_v1 }
 0x876   : > { %3780 = vmatmul.mubr.msk.f32.vlgmr.msra.gmra.mrb[16].mxu0 %vm937_vm1, %v5636_v33 }
 0x877   : > { %3794 = vmatprep.mubr.msk.f32.mxu0 %vm4885_vm0, %v4886_v1  ;;  %3793 = vmatpush3.msra.mxu0 %v2505_v45 }
 0x878   : > { %3808 = vmatprep.subr.mxu0 %v4886_v1 }
 0x941   : > { %v2180_v27 = vpop.f32.mrb[14].mxu0 }
 0x942   : > { %v2254_v28 = vadd.f32 %v2253_v25, %v2180_v27  ;;  %v3765_v29 = vpop.f32.mrb[15].mxu0 }
 0x949   : > { %v2336_v31 = vpop.f32.mrb[16].mxu0 }
 0x94a   : > { %v2337_v32 = vadd.f32 %v3508_v30, %v2336_v31  ;;  %v3781_v34 = vpop.f32.mrb[17].mxu0  ;;  %v2942_v31 = vld [vmem:[#allocation25] sm:$0xff] }
 0x94b   : > { %v2944_v34 = vld [vmem:[#allocation25 + $0x10] sm:$0xff] }
 0x94c   : > { %3785 = vmatmul.mubr.msk.f32.vlgmr.msra.gmra.mrb[16].mxu1 %vm1011_vm2, %v2337_v32  ;;  %v2943_v32 = vld [vmem:[#allocation25 + $0x8] sm:$0xff] }
 0x94d   : > { %3788 = vmatpush3.msra.mxu1 %v2430_v35  ;;  %3789 = vmatprep.mubr.msk.f32.mxu1 %vm4885_vm0, %v4886_v1  ;;  %v2945_v35 = vld [vmem:[#allocation25 + $0x18] sm:$0xff] }
 0x94e   : > { %3919 = vmatprep.subr.bf16.mxu1 %v4884_v0 }
 0xa1f   : > { %v2414_v36 = vpop.f32.mrb[16].mxu1 }
 0xa20   : > { %v2415_v37 = vadd.f32 %v5666_v5, %v2414_v36  ;;  %v3786_v38 = vpop.f32.mrb[17].mxu1  ;;  %v3929_v36 = vpack.c.bf16 %v2945_v35, %v2944_v34 }
 0xa21   : > { %v3029_v38 = vld [vmem:[#allocation28 + $0x10] sm:$0xff] }
 0xa22   : > { %v2418_v39 = vsel %vm1011_vm2, %v2415_v37, -inf }
 0xa23   : > { %2419 = vmax.xlane.f32.xlu0 %v2418_v39 }
 0xab0   : > { %v2420_v40 = vpop.xlane.xlu0 %2419 }
 0xab1   : > { %v2421_v41 = vsub.f32 %v2415_v37, %v2420_v40  ;;  %v3028_v37 = vld [vmem:[#allocation28 + $0x8] sm:$0xff]  ;;  %v3030_v40 = vld [vmem:[#allocation28 + $0x18] sm:$0xff] }
 0xab3   : > { %v2422_v42 = vmul.f32 1.442695, %v2421_v41  ;;  %v3935_v41 = vpack.c.bf16 %v3030_v40, %v3029_v38 }
 0xab5   : > { %4191 = vpow2.f32 %v2422_v42  ;;  %v3031_v42 = vld [vmem:[#allocation28 + $0x20] sm:$0xff] }
 0xabf   : > { %v4192_v43 = vpop.eup %4191 }
 0xac0   : > { %v2424_v44 = vsel %vm1011_vm2, %v4192_v43, 0.0 }
 0xac1   : > { %2425 = vadd.xlane.f32.xlu1 %v2424_v44 }
 0xb4e   : > { %v2426_v46 = vpop.xlane.xlu1 %2425 }
 0xb4f   : > { %4193 = vrcp.f32 %v2426_v46 }
 0xb59   : > { %v4194_v49 = vpop.eup %4193 }
 0xb5a   : > { %v2428_v50 = vmul.f32 %v4194_v49, %v4192_v43  ;;  %v3032_v43 = vld [vmem:[#allocation28 + $0x28] sm:$0xff]  ;;  %v3521_v49 = vld [vmem:[#allocation22] ss:$0 sm:$0xff] }
 0xb5b   : > { %v3938_v44 = vpack.c.bf16 %v3032_v43, %v3031_v42 }
 0xb5c   : > { %3790 = vmatmul.mubr.msk.f32.vlgmr.msra.gmra.mrb[18].mxu1 %vm1011_vm2, %v2428_v50  ;;  %v3522_v50 = vld [vmem:[#allocation24] ss:$0 sm:$0xff] }
 0xb5d   : > { %3921 = vmatpush3.bf16.msra.mxu1 %v3920_v10  ;;  %3805 = vmatprep.mubr.msk.f32.mxu1 %vm4885_vm0, %v4886_v1 }
 0xb5e   : > { %3922 = vmatprep.subr.bf16.mxu1 %v4884_v0 }
 0xb61   : > { %3924 = vmatpush3.bf16.msra.mxu1 %v3923_v53  ;;  %v3033_v53 = vld [vmem:[#allocation28 + $0x30] sm:$0xff] }
 0xb62   : > { %3818 = vmatprep.subr.mxu1 %v4886_v1 }
 0xb64   : > { %3806 = vmatmul.mubr.msk.f32.vlgmr.msra.gmra.mrb[20].mxu1 %vm937_vm1, %v5636_v33 }
 0xb65   : > { %3820 = vmatprep.mubr.msk.f32.mxu1 %vm4885_vm0, %v4886_v1  ;;  %3819 = vmatpush3.msra.mxu1 %v2828_v14 }
 0xb66   : > { %3931 = vmatprep.subr.bf16.mxu1 %v4884_v0 }
 0xc2f   : > { %v2500_v54 = vpop.f32.mrb[18].mxu1 }
 0xc30   : > { %v3791_v55 = vpop.f32.mrb[19].mxu1  ;;  %3795 = vmatmul.mubr.msk.f32.vlgmr.msra.gmra.mrb[18].mxu0 %vm1011_vm2, %v2500_v54  ;;  %v3034_v54 = vld [vmem:[#allocation28 + $0x38] sm:$0xff] }
 0xc31   : > { %3809 = vmatpush3.xpose.msk.msra.mxu0 %vm1011_vm2, %v2664_v56  ;;  %3810 = vmatprep.mubr.msk.f32.mxu0 %vm4885_vm0, %v4886_v1  ;;  %v3941_v55 = vpack.c.bf16 %v3034_v54, %v3033_v53  ;;  %v3523_v56 = vld [vmem:[#allocation27] ss:$0 sm:$0xff] }
 0xc32   : > { %3813 = vmatprep.subr.mxu0 %v4886_v1 }
 0xc37   : > { %v2659_v58 = vpop.f32.mrb[20].mxu1 }
 0xc38   : > { %v2660_v59 = vadd.f32 %v3514_v57, %v2659_v58  ;;  %v3807_v60 = vpop.f32.mrb[21].mxu1 }
 0xc39   : > { %v3525_v60 = vld [vmem:[#allocation30] ss:$0 sm:$0xff] }
 0xc3a   : > { %3811 = vmatmul.mubr.msk.f32.vlgmr.msra.gmra.mrb[20].mxu0 %vm1011_vm2, %v2660_v59 }
 0xc3b   : > { %3814 = vmatpush3.msra.mxu0 %v2753_v61  ;;  %3815 = vmatprep.mubr.msk.f32.mxu0 %vm4885_vm0, %v4886_v1 }
 0xc3c   : > { %3925 = vmatprep.subr.bf16.mxu0 %v4884_v0 }
 0xd03   : > { %v2575_v62 = vpop.f32.mrb[18].mxu0 }
 0xd04   : > { %v2579_v63 = vadd.f32 %v2575_v62, %v2254_v28  ;;  %v3796_v2 = vpop.f32.mrb[19].mxu0 }
 0xd0d   : > { %v2737_v3 = vpop.f32.mrb[20].mxu0 }
 0xd0e   : > { %v2738_v4 = vadd.f32 %v5666_v5, %v2737_v3  ;;  %v3812_v6 = vpop.f32.mrb[21].mxu0 }
 0xd10   : > { %v2741_v7 = vsel %vm1011_vm2, %v2738_v4, -inf }
 0xd11   : > { %2742 = vmax.xlane.f32.xlu0 %v2741_v7 }
 0xd9e   : > { %v2743_v8 = vpop.xlane.xlu0 %2742 }
 0xd9f   : > { %v2744_v9 = vsub.f32 %v2738_v4, %v2743_v8 }
 0xda1   : > { %v2745_v11 = vmul.f32 1.442695, %v2744_v9 }
 0xda3   : > { %4195 = vpow2.f32 %v2745_v11 }
 0xdad   : > { %v4196_v12 = vpop.eup %4195 }
 0xdae   : > { %v2747_v13 = vsel %vm1011_vm2, %v4196_v12, 0.0 }
 0xdaf   : > { %2748 = vadd.xlane.f32.xlu1 %v2747_v13 }
 0xe3c   : > { %v2749_v15 = vpop.xlane.xlu1 %2748 }
 0xe3d   : > { %4197 = vrcp.f32 %v2749_v15  ;;  %v3527_v15 = vld [vmem:[#allocation31] ss:$0 sm:$0xff] }
 0xe47   : > { %v4198_v16 = vpop.eup %4197 }
 0xe48   : > { %v2751_v5 = vmul.f32 %v4198_v16, %v4196_v12 }
 0xe4a   : > { %3816 = vmatmul.mubr.msk.f32.vlgmr.msra.gmra.mrb[22].mxu0 %vm1011_vm2, %v2751_v5  ;;  %v3528_v5 = vld [vmem:[#allocation33] ss:$0 sm:$0xff] }
 0xe4b   : > { %3831 = vmatprep.mubr.msk.f32.mxu0 %vm4885_vm0, %v4886_v1 }
 0xf1d   : > { %v2823_v17 = vpop.f32.mrb[22].mxu0 }
 0xf1e   : > { %v3817_v18 = vpop.f32.mrb[23].mxu0  ;;  %3821 = vmatmul.mubr.msk.f32.vlgmr.msra.gmra.mrb[22].mxu1 %vm1011_vm2, %v2823_v17 }
 0xf1f   : > { %3850 = vmatprep.mubr.msk.f32.mxu1 %vm4885_vm0, %v4886_v1  ;;  %v3926_v1 = vpack.c.bf16 %v2943_v32, %v2942_v31 }
 0xf21   : > { %3927 = vmatpush3.bf16.msra.mxu0 %v3926_v1 }
 0xf22   : > { %3928 = vmatprep.subr.bf16.mxu0 %v4884_v0 }
 0xf25   : > { %3930 = vmatpush3.bf16.msra.mxu0 %v3929_v36 }
 0xff1   : > { %v2898_v19 = vpop.f32.mrb[22].mxu1 }
 0xff2   : > { %v2902_v21 = vadd.f32 %v2898_v19, %v2579_v63  ;;  %v3822_v22 = vpop.f32.mrb[23].mxu1 }
 0xff4   : > { %v2910_v23 = vadd.f32 %v3520_v20, %v2902_v21 }
 0xff6   : > { %v2911_v24 = vadd.f32 %v2910_v23, %v5636_v33  ;;  %v3027_v33 = vld [vmem:[#allocation28] sm:$0xff] }
 0xff7   : > { %v3932_v39 = vpack.c.bf16 %v3028_v37, %v3027_v33 }
 0xff8   : > { %v2912_v25 = vsel %vm937_vm1, %v2911_v24, 0.0 }
 0xff9   : > { %2913 = vadd.xlane.f32.xlu0 %v2912_v25  ;;  %3933 = vmatpush3.bf16.msra.mxu1 %v3932_v39 }
 0xffa   : > { %3934 = vmatprep.subr.bf16.mxu1 %v4884_v0 }
 0xffd   : > { %3936 = vmatpush3.bf16.msra.mxu1 %v3935_v41 }
 0xffe   : > { %3937 = vmatprep.subr.bf16.mxu1 %v4884_v0 }
0x1001   : > { %3939 = vmatpush3.bf16.msra.mxu1 %v3938_v44 }
0x1002   : > { %3940 = vmatprep.subr.bf16.mxu1 %v4884_v0 }
0x1005   : > { %3942 = vmatpush3.bf16.msra.mxu1 %v3941_v55 }
0x1086   : > { %v2914_v26 = vpop.xlane.xlu0 %2913 }
0x1087   : > { %v2916_v27 = vmul.f32 0.03125, %v2914_v26 }
0x1089   : > { %v2917_v28 = vsub.f32 %v2911_v24, %v2916_v27 }
0x108b   : > { %v2918_v29 = vmul.f32 %v2917_v28, %v2917_v28 }
0x108d   : > { %v2919_v30 = vsel %vm937_vm1, %v2918_v29, 0.0 }
0x108e   : > { %2920 = vadd.xlane.f32.xlu1 %v2919_v30 }
0x111b   : > { %v2921_v45 = vpop.xlane.xlu1 %2920 }
0x111c   : > { %v2922_v46 = vmul.f32 0.03125, %v2921_v45 }
0x111e   : > { %v2923_v47 = vadd.f32 1e-05, %v2922_v46 }
0x1120   : > { %4199 = vrsqrt.f32 %v2923_v47 }
0x112a   : > { %v4200_v48 = vpop.eup %4199 }
0x112b   : > { %v2925_v10 = vmul.f32 %v4200_v48, %v2917_v28 }
0x112d   : > { %v2933_v51 = vmul.f32 %v3521_v49, %v2925_v10 }
0x112f   : > { %v2941_v52 = vadd.f32 %v3522_v50, %v2933_v51 }
0x1131   : > { %3832 = vmatmul.mubr.msk.f32.vlgmr.msra.gmra.mrb[24].mxu0 %vm937_vm1, %v2941_v52 }
0x1204   : > { %v3022_v57 = vpop.f32.mrb[24].mxu0 }
0x1205   : > { %v3023_v58 = vadd.f32 %v3523_v56, %v3022_v57  ;;  %v3833_v0 = vpop.f32.mrb[25].mxu0 }
0x1207   : > { %v3026_v59 = vmax.f32 %v3023_v58, 0.0 }
0x1209   : > { %3851 = vmatmul.mubr.msk.f32.vlgmr.msra.gmra.mrb[24].mxu1 %vm3042_vm3, %v3026_v59 }
0x12dc   : > { %v3112_v61 = vpop.f32.mrb[24].mxu1 }
0x12dd   : > { %v3113_v62 = vadd.f32 %v3525_v60, %v3112_v61  ;;  %v3852_v63 = vpop.f32.mrb[25].mxu1 }
0x12df   : > { %v3116_v2 = vadd.f32 %v3113_v62, %v2941_v52 }
0x12e1   : > { %v3117_v3 = vsel %vm937_vm1, %v3116_v2, 0.0 }
0x12e2   : > { %3118 = vadd.xlane.f32.xlu0 %v3117_v3 }
0x136f   : > { %v3119_v4 = vpop.xlane.xlu0 %3118 }
0x1370   : > { %v3120_v6 = vmul.f32 0.03125, %v3119_v4 }
0x1372   : > { %v3121_v7 = vsub.f32 %v3116_v2, %v3120_v6 }
0x1374   : > { %v3122_v8 = vmul.f32 %v3121_v7, %v3121_v7 }
0x1376   : > { %v3123_v9 = vsel %vm937_vm1, %v3122_v8, 0.0 }
0x1377   : > { %3124 = vadd.xlane.f32.xlu1 %v3123_v9 }
0x1404   : > { %v3125_v11 = vpop.xlane.xlu1 %3124 }
0x1405   : > { %v3126_v12 = vmul.f32 0.03125, %v3125_v11 }
0x1407   : > { %v3127_v13 = vadd.f32 1e-05, %v3126_v12 }
0x1409   : > { %4201 = vrsqrt.f32 %v3127_v13 }
0x1413   : > { %v4202_v14 = vpop.eup %4201 }
0x1414   : > { %v3129_v16 = vmul.f32 %v4202_v14, %v3121_v7 }
0x1416   : > { %v3137_v17 = vmul.f32 %v3527_v15, %v3129_v16 }
0x1418   : > { %v3145_v18 = vadd.f32 %v3528_v5, %v3137_v17 }
0x141a   : > { %3146 = vst.msk [vmem:[%s920_s19] sm:$0xff] %vm937_vm1, %v3145_v18 }
0x141b   : > { %4754 = shalt.err (!%p4751_p10)
}
0x141c   : > { %s4755_s13 = scalar_lea.hbm %s5776_s5, 128  ;;  %s4759_s14 = scalar_lea.hbm %s5964_s9, 256 }
0x141d   : > { %p4756_p1 = scmp.ne.s32.totalorder %s5776_s5, %s4755_s13  ;;  %p4760_p11 = scmp.lt.u32.totalorder %s5776_s5, %s5964_s9 }
0x141e   : > { %p4761_p7 = scmp.lt.u32.totalorder %s4759_s14, %s4755_s13  ;;  %p4763_p13 = scmp.lt.u32.totalorder %s4755_s13, %s5776_s5 }
0x141f   : > { %p4757_p5 = pnand %p4756_p1, %p5965_p2 }
0x1420   : > { %p4762_p3 = por %p4761_p7, %p4760_p11 }
0x1421   : > { %p4758_p0 = pneg %p4757_p5 }
0x1422   : > { %p4764_p4 = por %p4763_p13, %p4762_p3 }
0x1424   : > { %p4765_p8 = pnand %p4764_p4, %p4758_p0 }
0x1426   : > { %4768 = shalt.err (!%p4765_p8)
}
0x1427   : > { %4013 = dma.vmem_to_hbm [thread:$0]  (%p5965_p2), %s5778_s29, 128, %s5776_s5, %s3148_s27  }
0x1428 PF: > { %s3174_s4 = sand.u32 1, %s4839_s0   ;;  %p5966_p12 = scmp.ne.s32.totalorder %s5923_s25, 0 }
0x1429   : > { %p5967_p6 = scmp.ge.s32.totalorder %s4859_s22, 2  ;;  %s3175_s6 = scalar_lea.sflag [#allocation6], %s3174_s4 }
0x142b   : > { %p4075_p9 = pnand %p5967_p6, %p5966_p12 }
0x142d   : > { %4834 = dma.done.wait (!%p4075_p9), %s3175_s6, 128  }
0x142e   : > { %4836 = vsyncadd (!%p4075_p9), %s3175_s6, 4294967168  ;;  %s46_s22 = sadd.s32 1, %s4859_s22   ;;  %s5968_s2 = sld [smem:[#allocation46_spill]] }
0x142f   : > { %p43_p10 = scmp.ge.s32.totalorder %s46_s22, 4   ;;  %s5969_s20 = sld [smem:[#allocation50_spill]] }
0x1430   : > { %s5970_s28 = sld [smem:[#allocation49_spill]]  ;;  %s5971_s0 = smov %s4843_s30 }
0x1431   : > { %s5973_s21 = smov %s4855_s1  ;;  %45 = sbr.rel (!%p43_p10) target bundleno = 37 (0x25), region = 266 }
0x1434   : > { %s5972_s30 = smov %s5968_s2 }
0x1436   : > { %s5974_s1 = smov %s5970_s28 }
0x1438   :  { %3180 = vsyncpa [#allocation5], 1 }
0x1439   :  { %3182 = vsyncpa [#allocation5 + $0x1], 1 }
0x143a   :  { %3183 = vsyncpa [#allocation8], 1 }
0x143b   :  { %3185 = vsyncpa [#allocation8 + $0x1], 1 }
0x143c   :  { %3186 = vsyncpa [#allocation11], 1 }
0x143d   :  { %3187 = vsyncpa [#allocation14], 1 }
0x143e   :  { %3188 = vsyncpa [#allocation17], 1 }
0x143f   :  { %3189 = vsyncpa [#allocation20], 1 }
0x1440   :  { %3190 = vsyncpa [#allocation23], 1 }
0x1441   :  { %3191 = vsyncpa [#allocation26], 1 }
0x1442   :  { %3192 = vsyncpa [#allocation29], 1 }
0x1443   :  { %3193 = vsyncpa [#allocation32], 1 }
0x1444   :  { %3194 = vsyncpa [#allocation6], 1 }
0x1445   :  { %3196 = vsyncpa [#allocation6 + $0x1], 1 }

</bundles_post_ra>
